<compile_context>
chip_gen: v7x
topology: tpu7x:2x2x1
jax: 0.10.0
libtpu: 0.0.40
codegen_flags: <defaults>
</compile_context>

<pallas_src>
import jax
import jax.numpy as jnp
from jax.experimental import pallas as pl
from jax.experimental.pallas import tpu as pltpu

# ---------------------------------------------------------------------------
# Model dimensions (consistent with the PyTorch module's __init__)
# ---------------------------------------------------------------------------
INPUT_SIZE = 32
H1 = 1024
H2 = 512
OUTPUT_SIZE = 16
OUT_PAD = 128                 # lane-dense padded output width (multiple of 128)
BIAS_W = H1 + H2 + OUT_PAD    # 1664 = 13 * 128 -> all bias slices lane-aligned
TILE_B = 16                   # batch rows per grid step (multiple of 8 sublanes)
BATCH = 16
BN_EPS = 1e-5                 # PyTorch nn.BatchNorm1d default


# ---------------------------------------------------------------------------
# Fused kernel: one grid step = TILE_B rows.  Weights/biases use constant
# index_maps so they are DMA'd once and stay VMEM-resident across the grid.
# ---------------------------------------------------------------------------
def syenet_kernel(x_ref, w1_ref, w2_ref, w3_ref, b_ref, o_ref):
    # ---- fc1 (+ folded bn1) + relu; dropout1 = identity in eval mode ------
    x = x_ref[...].astype(jnp.bfloat16)
    h = jnp.dot(x, w1_ref[...], preferred_element_type=jnp.float32)
    h = jnp.maximum(h + b_ref[:, 0:H1], 0.0)

    # ---- fc2 (+ folded bn2) + relu; dropout2 = identity in eval mode ------
    h = jnp.dot(h.astype(jnp.bfloat16), w2_ref[...],
                preferred_element_type=jnp.float32)
    h = jnp.maximum(h + b_ref[:, H1:H1 + H2], 0.0)

    # ---- fc3 (lane-padded to 128 output columns -> unmasked store) --------
    out = jnp.dot(h.astype(jnp.bfloat16), w3_ref[...],
                  preferred_element_type=jnp.float32)
    o_ref[...] = (out + b_ref[:, H1 + H2:BIAS_W]).astype(o_ref.dtype)


@jax.jit
def syenet_forward(x, folded_params):
    """x: [B, INPUT_SIZE] float32 -> [B, OUTPUT_SIZE] float32."""
    w1, w2, w3p, bias = folded_params
    B = x.shape[0]
    n_chunks = pl.cdiv(B, TILE_B)
    b_pad = n_chunks * TILE_B
    if b_pad != B:
        x = jnp.pad(x, ((0, b_pad - B), (0, 0)))

    out_padded = pl.pallas_call(
        syenet_kernel,
        out_shape=jax.ShapeDtypeStruct((b_pad, OUT_PAD), jnp.float32),
        grid=(n_chunks,),
        in_specs=[
            pl.BlockSpec((TILE_B, INPUT_SIZE), lambda n: (n, 0)),   # streams
            pl.BlockSpec((INPUT_SIZE, H1), lambda n: (0, 0)),       # resident
            pl.BlockSpec((H1, H2), lambda n: (0, 0)),               # resident
            pl.BlockSpec((H2, OUT_PAD), lambda n: (0, 0)),          # resident
            pl.BlockSpec((1, BIAS_W), lambda n: (0, 0)),            # resident
        ],
        out_specs=pl.BlockSpec((TILE_B, OUT_PAD), lambda n: (n, 0)),
        compiler_params=pltpu.CompilerParams(
            dimension_semantics=("arbitrary",)),
    )(x, w1, w2, w3p, bias)

    return out_padded[:B, :OUTPUT_SIZE]


# ---------------------------------------------------------------------------
# Deterministic parameter init (synthetic; shapes match the PyTorch module)
# ---------------------------------------------------------------------------
def init_raw_params(key):
    keys = jax.random.split(key, 16)

    def lin(kw, kb, fan_in, fan_out):
        bound = 1.0 / jnp.sqrt(fan_in)
        w = jax.random.uniform(kw, (fan_in, fan_out), jnp.float32, -bound, bound)
        b = jax.random.uniform(kb, (1, fan_out), jnp.float32, -bound, bound)
        return w, b

    w1, b1 = lin(keys[0], keys[1], INPUT_SIZE, H1)
    w2, b2 = lin(keys[2], keys[3], H1, H2)
    w3, b3 = lin(keys[4], keys[5], H2, OUTPUT_SIZE)

    # BatchNorm1d params + running stats (eval-mode semantics).
    g1 = 1.0 + 0.1 * jax.random.normal(keys[6], (1, H1), jnp.float32)
    be1 = 0.1 * jax.random.normal(keys[7], (1, H1), jnp.float32)
    m1 = 0.1 * jax.random.normal(keys[8], (1, H1), jnp.float32)
    v1 = jax.random.uniform(keys[9], (1, H1), jnp.float32, 0.5, 1.5)

    g2 = 1.0 + 0.1 * jax.random.normal(keys[10], (1, H2), jnp.float32)
    be2 = 0.1 * jax.random.normal(keys[11], (1, H2), jnp.float32)
    m2 = 0.1 * jax.random.normal(keys[12], (1, H2), jnp.float32)
    v2 = jax.random.uniform(keys[13], (1, H2), jnp.float32, 0.5, 1.5)

    return (w1, b1, g1, be1, m1, v1,
            w2, b2, g2, be2, m2, v2,
            w3, b3)


def fold_params(raw):
    """Fold eval-mode BatchNorm into the linear weights/biases, cast weights
    to bf16, zero-pad fc3 to OUT_PAD output columns, and pack the three f32
    biases into one lane-aligned [1, BIAS_W] array."""
    (w1, b1, g1, be1, m1, v1,
     w2, b2, g2, be2, m2, v2,
     w3, b3) = raw

    s1 = g1 * jax.lax.rsqrt(v1 + BN_EPS)
    w1f = (w1 * s1).astype(jnp.bfloat16)
    b1f = ((b1 - m1) * s1 + be1).astype(jnp.float32)

    s2 = g2 * jax.lax.rsqrt(v2 + BN_EPS)
    w2f = (w2 * s2).astype(jnp.bfloat16)
    b2f = ((b2 - m2) * s2 + be2).astype(jnp.float32)

    w3p = jnp.zeros((H2, OUT_PAD), jnp.float32).at[:, :OUTPUT_SIZE].set(w3)
    w3p = w3p.astype(jnp.bfloat16)
    b3p = jnp.zeros((1, OUT_PAD), jnp.float32).at[:, :OUTPUT_SIZE].set(b3)

    bias = jnp.concatenate([b1f, b2f, b3p], axis=1)   # [1, BIAS_W]
    return w1f, w2f, w3p, bias


# ---------------------------------------------------------------------------
# References
# ---------------------------------------------------------------------------
def reference_forward_f32(x, raw):
    (w1, b1, g1, be1, m1, v1,
     w2, b2, g2, be2, m2, v2,
     w3, b3) = raw
    h = x @ w1 + b1
    h = (h - m1) / jnp.sqrt(v1 + BN_EPS) * g1 + be1
    h = jnp.maximum(h, 0.0)
    h = h @ w2 + b2
    h = (h - m2) / jnp.sqrt(v2 + BN_EPS) * g2 + be2
    h = jnp.maximum(h, 0.0)
    return h @ w3 + b3


def reference_forward_folded(x, folded):
    """Same numerics as the kernel (bf16 weights, f32 accumulation)."""
    w1, w2, w3p, bias = folded
    b1 = bias[:, 0:H1]
    b2 = bias[:, H1:H1 + H2]
    b3 = bias[:, H1 + H2:BIAS_W]
    h = jnp.dot(x.astype(jnp.bfloat16), w1,
                preferred_element_type=jnp.float32) + b1
    h = jnp.maximum(h, 0.0)
    h = jnp.dot(h.astype(jnp.bfloat16), w2,
                preferred_element_type=jnp.float32) + b2
    h = jnp.maximum(h, 0.0)
    out = jnp.dot(h.astype(jnp.bfloat16), w3p,
                  preferred_element_type=jnp.float32) + b3
    return out[:, :OUTPUT_SIZE]


if __name__ == "__main__":
    key = jax.random.PRNGKey(0)
    kx, kp = jax.random.split(key)

    x = jax.random.normal(kx, (BATCH, INPUT_SIZE), jnp.float32)
    raw = init_raw_params(kp)
    folded = fold_params(raw)

    out = syenet_forward(x, folded)
    out = jax.block_until_ready(out)
    assert out.shape == (BATCH, OUTPUT_SIZE)

    # Tight check against a reference with identical (bf16-weight) numerics.
    ref_folded = reference_forward_folded(x, folded)
    assert jnp.allclose(out, ref_folded, atol=1e-2, rtol=1e-2)

    # Loose check against the full-precision f32 reference (bf16 weights give
    # ~1e-2 relative error).
    ref_f32 = reference_forward_f32(x, raw)
    assert jnp.allclose(out, ref_f32, atol=1e-1, rtol=1e-1)

    # Exercise the multi-chunk grid path (weights stay VMEM-resident across
    # grid steps; batch padded 40 -> 48 = 3 chunks of TILE_B).
    x_big = jax.random.normal(jax.random.PRNGKey(1), (40, INPUT_SIZE),
                              jnp.float32)
    out_big = jax.block_until_ready(syenet_forward(x_big, folded))
    assert out_big.shape == (40, OUTPUT_SIZE)
    ref_big = reference_forward_folded(x_big, folded)
    assert jnp.allclose(out_big, ref_big, atol=1e-2, rtol=1e-2)

    print("KERNEL_OK")
</pallas_src>

<mosaic_0001>
module attributes {stable_mosaic.version = 11 : i64} {
  func.func @syenet_kernel(%arg0: i32, %arg1: memref<16x32xf32, #tpu.memory_space<vmem>>, %arg2: memref<32x1024xbf16, #tpu.memory_space<vmem>>, %arg3: memref<1024x512xbf16, #tpu.memory_space<vmem>>, %arg4: memref<512x128xbf16, #tpu.memory_space<vmem>>, %arg5: memref<1x1664xf32, #tpu.memory_space<vmem>>, %arg6: memref<16x128xf32, #tpu.memory_space<vmem>>) attributes {dimension_semantics = [#tpu.dimension_semantics<arbitrary>], iteration_bounds = array<i64: 1>, scalar_prefetch = 0 : i64, scratch_operands = 0 : i64, tpu.core_type = #tpu.core_type<tc>, window_params = [{transform_indices = @transform_0, window_bounds = array<i64: 16, 32>}, {pipeline_mode = #tpu.pipeline_mode<synchronous>, transform_indices = @transform_1, window_bounds = array<i64: 32, 1024>}, {pipeline_mode = #tpu.pipeline_mode<synchronous>, transform_indices = @transform_2, window_bounds = array<i64: 1024, 512>}, {pipeline_mode = #tpu.pipeline_mode<synchronous>, transform_indices = @transform_3, window_bounds = array<i64: 512, 128>}, {pipeline_mode = #tpu.pipeline_mode<synchronous>, transform_indices = @transform_4, window_bounds = array<i64: 1, 1664>}, {transform_indices = @transform_5, window_bounds = array<i64: 16, 128>}]} {
    %c0 = arith.constant 0 : index
    %c0_0 = arith.constant 0 : index
    %0 = vector.load %arg1[%c0, %c0_0] : memref<16x32xf32, #tpu.memory_space<vmem>>, vector<16x32xf32>
    %1 = arith.truncf %0 : vector<16x32xf32> to vector<16x32xbf16>
    %c0_1 = arith.constant 0 : index
    %c0_2 = arith.constant 0 : index
    %2 = vector.load %arg2[%c0_1, %c0_2] : memref<32x1024xbf16, #tpu.memory_space<vmem>>, vector<32x1024xbf16>
    %cst = arith.constant dense<0.000000e+00> : vector<16x1024xf32>
    %3 = tpu.matmul %1, %2, %cst {dimension_numbers = #tpu.dot_dimension_numbers<[1], [0], [0], [1], [0, 0, 1, 1], [], []>} : vector<16x32xbf16>, vector<32x1024xbf16>, vector<16x1024xf32> -> vector<16x1024xf32>
    %c0_3 = arith.constant 0 : index
    %c0_4 = arith.constant 0 : index
    %4 = vector.load %arg5[%c0_3, %c0_4] : memref<1x1664xf32, #tpu.memory_space<vmem>>, vector<1x1024xf32>
    %5 = vector.broadcast %4 : vector<1x1024xf32> to vector<16x1024xf32>
    %6 = arith.addf %3, %5 : vector<16x1024xf32>
    %cst_5 = arith.constant 0.000000e+00 : f32
    %7 = vector.broadcast %cst_5 : f32 to vector<16x1024xf32>
    %8 = arith.maximumf %6, %7 : vector<16x1024xf32>
    %9 = arith.truncf %8 : vector<16x1024xf32> to vector<16x1024xbf16>
    %c0_6 = arith.constant 0 : index
    %c0_7 = arith.constant 0 : index
    %10 = vector.load %arg3[%c0_6, %c0_7] : memref<1024x512xbf16, #tpu.memory_space<vmem>>, vector<1024x512xbf16>
    %cst_8 = arith.constant dense<0.000000e+00> : vector<16x512xf32>
    %11 = tpu.matmul %9, %10, %cst_8 {dimension_numbers = #tpu.dot_dimension_numbers<[1], [0], [0], [1], [0, 0, 1, 1], [], []>} : vector<16x1024xbf16>, vector<1024x512xbf16>, vector<16x512xf32> -> vector<16x512xf32>
    %c0_9 = arith.constant 0 : index
    %c1024 = arith.constant 1024 : index
    %12 = vector.load %arg5[%c0_9, %c1024] : memref<1x1664xf32, #tpu.memory_space<vmem>>, vector<1x512xf32>
    %13 = vector.broadcast %12 : vector<1x512xf32> to vector<16x512xf32>
    %14 = arith.addf %11, %13 : vector<16x512xf32>
    %cst_10 = arith.constant 0.000000e+00 : f32
    %15 = vector.broadcast %cst_10 : f32 to vector<16x512xf32>
    %16 = arith.maximumf %14, %15 : vector<16x512xf32>
    %17 = arith.truncf %16 : vector<16x512xf32> to vector<16x512xbf16>
    %c0_11 = arith.constant 0 : index
    %c0_12 = arith.constant 0 : index
    %18 = vector.load %arg4[%c0_11, %c0_12] : memref<512x128xbf16, #tpu.memory_space<vmem>>, vector<512x128xbf16>
    %cst_13 = arith.constant dense<0.000000e+00> : vector<16x128xf32>
    %19 = tpu.matmul %17, %18, %cst_13 {dimension_numbers = #tpu.dot_dimension_numbers<[1], [0], [0], [1], [0, 0, 1, 1], [], []>} : vector<16x512xbf16>, vector<512x128xbf16>, vector<16x128xf32> -> vector<16x128xf32>
    %c0_14 = arith.constant 0 : index
    %c1536 = arith.constant 1536 : index
    %20 = vector.load %arg5[%c0_14, %c1536] : memref<1x1664xf32, #tpu.memory_space<vmem>>, vector<1x128xf32>
    %21 = vector.broadcast %20 : vector<1x128xf32> to vector<16x128xf32>
    %22 = arith.addf %19, %21 : vector<16x128xf32>
    %c0_15 = arith.constant 0 : index
    %c0_16 = arith.constant 0 : index
    %23 = vector.load %arg6[%c0_15, %c0_16] : memref<16x128xf32, #tpu.memory_space<vmem>>, vector<16x128xf32>
    tpu.vector_store %arg6[%c0_15, %c0_16], %22 {strides = array<i32>} : memref<16x128xf32, #tpu.memory_space<vmem>>, vector<16x128xf32>,
    return
  }
  func.func @transform_0(%arg0: i32) -> (i32, i32) {
    %c0_i32 = arith.constant 0 : i32
    %c0_i32_0 = arith.constant 0 : i32
    return %arg0, %c0_i32 : i32, i32
  }
  func.func @transform_1(%arg0: i32) -> (i32, i32) {
    %c0_i32 = arith.constant 0 : i32
    %c0_i32_0 = arith.constant 0 : i32
    %c0_i32_1 = arith.constant 0 : i32
    return %c0_i32, %c0_i32_0 : i32, i32
  }
  func.func @transform_2(%arg0: i32) -> (i32, i32) {
    %c0_i32 = arith.constant 0 : i32
    %c0_i32_0 = arith.constant 0 : i32
    %c0_i32_1 = arith.constant 0 : i32
    return %c0_i32, %c0_i32_0 : i32, i32
  }
  func.func @transform_3(%arg0: i32) -> (i32, i32) {
    %c0_i32 = arith.constant 0 : i32
    %c0_i32_0 = arith.constant 0 : i32
    %c0_i32_1 = arith.constant 0 : i32
    return %c0_i32, %c0_i32_0 : i32, i32
  }
  func.func @transform_4(%arg0: i32) -> (i32, i32) {
    %c0_i32 = arith.constant 0 : i32
    %c0_i32_0 = arith.constant 0 : i32
    %c0_i32_1 = arith.constant 0 : i32
    return %c0_i32, %c0_i32_0 : i32, i32
  }
  func.func @transform_5(%arg0: i32) -> (i32, i32) {
    %c0_i32 = arith.constant 0 : i32
    %c0_i32_0 = arith.constant 0 : i32
    return %arg0, %c0_i32 : i32, i32
  }
}

</mosaic_0001>

<bundles_post_ra>
// kernel: syenet_forward.1
= control target key start
LH: loop header
LB: loop body
LE: loop exit
PB: predicated region body
PF: predicated region fallthrough
CT: control target
= control target key end

     0   :  { %10 = vsyncpa [#allocation3], 0  ;;  %s3810_s0 = inlined_call_operand.hbm [shape: f32[16,32], index: 0, kind: input, shape index: {}]   ;;  %s3811_s1 = inlined_call_operand.hbm [shape: bf16[32,1024], index: 1, kind: input, shape index: {}]   ;;  %s3812_s2 = inlined_call_operand.hbm [shape: bf16[1024,512], index: 2, kind: input, shape index: {}]   ;;  %s3813_s3 = inlined_call_operand.hbm [shape: bf16[512,128], index: 3, kind: input, shape index: {}]   ;;  %s3814_s4 = inlined_call_operand.vmem [shape: f32[1,1664], index: 4, kind: input, shape index: {}]   ;;  %s3815_s5 = inlined_call_operand.hbm [shape: f32[16,128], index: 5, kind: output, shape index: {}]  }
   0x1   :  { %11 = vsyncpa [#allocation6], 0 }
   0x2   :  { %12 = vsyncpa [#allocation9], 0 }
   0x3   :  { %13 = vsyncpa [#allocation4], 0  ;;  %s3631_s18 = smov [#allocation5]   ;;  %s3513_s22 = scalar_lea.hbm %s3811_s1, 2048 }
   0x4   :  { %s31_s19 = sshll.u32 %s3631_s18, 4  ;;  %p3514_p0 = scmp.ne.s32.totalorder %s3811_s1, %s3513_s22  ;;  %s32_s19 = int_to_ptr.vmem [resolvable:$true] %s31_s19 }
   0x5   :  { %p3517_p1 = scmp.lt.u32.totalorder %s3513_s22, %s3811_s1 }
   0x7   :  { %p3519_p2 = pnand %p3517_p1, %p3514_p0 }
   0x9   :  { %3522 = shalt.err (!%p3519_p2)
}
   0xa   :  { %s3523_s27 = scalar_lea.vmem %s32_s19, 2048  ;;  %p3528_p4 = scmp.lt.s32.totalorder %s32_s19, %s32_s19 }
   0xb   :  { %p3524_p3 = scmp.ne.s32.totalorder %s32_s19, %s3523_s27  ;;  %p3529_p5 = scmp.lt.s32.totalorder %s3523_s27, %s3523_s27 }
   0xd   :  { %p3530_p6 = por %p3529_p5, %p3528_p4 }
   0xf   :  { %p3531_p7 = pnand %p3530_p6, %p3524_p3 }
  0x11   :  { %3534 = shalt.err (!%p3531_p7)
}
  0x12   :  { %s3632_s28 = smov 512   ;;  %s3633_s29 = smov 32  }
  0x13   :  { %37 = dma.hbm_to_vmem [thread:$0]  %s3811_s1, 2048, %s32_s19, [#allocation6], %s3632_s28, %s3632_s28, %s3633_s29  }
  0x14   :  { %s3634_s7 = smov [#allocation2]   ;;  %s3535_s11 = scalar_lea.hbm %s3810_s0, 256 }
  0x15   :  { %s19_s8 = sshll.u32 %s3634_s7, 4  ;;  %p3536_p8 = scmp.ne.s32.totalorder %s3810_s0, %s3535_s11  ;;  %s20_s8 = int_to_ptr.vmem [resolvable:$true] %s19_s8 }
  0x16   :  { %p3539_p9 = scmp.lt.u32.totalorder %s3535_s11, %s3810_s0 }
  0x18   :  { %p3541_p10 = pnand %p3539_p9, %p3536_p8 }
  0x1a   :  { %3544 = shalt.err (!%p3541_p10)
}
  0x1b   :  { %s3545_s16 = scalar_lea.vmem %s20_s8, 256  ;;  %p3550_p12 = scmp.lt.s32.totalorder %s20_s8, %s20_s8 }
  0x1c   :  { %p3546_p11 = scmp.ne.s32.totalorder %s20_s8, %s3545_s16  ;;  %p3551_p13 = scmp.lt.s32.totalorder %s3545_s16, %s3545_s16 }
  0x1e   :  { %p3552_p0 = por %p3551_p13, %p3550_p12 }
  0x20   :  { %p3553_p1 = pnand %p3552_p0, %p3546_p11 }
  0x22   :  { %3556 = shalt.err (!%p3553_p1)
}
  0x23   :  { %s3635_s1 = smov 128   ;;  %s3636_s17 = smov 8  }
  0x24   :  { %25 = dma.hbm_to_vmem [thread:$0]  %s3810_s0, 256, %s20_s8, [#allocation3], %s3635_s1, %s3635_s1, %s3636_s17  }
  0x25   :  { %s3637_s20 = smov [#allocation7]   ;;  %s3557_s24 = scalar_lea.hbm %s3812_s2, 32768 }
  0x26   :  { %s43_s21 = sshll.u32 %s3637_s20, 4  ;;  %p3558_p2 = scmp.ne.s32.totalorder %s3812_s2, %s3557_s24  ;;  %s44_s21 = int_to_ptr.vmem [resolvable:$true] %s43_s21 }
  0x27   :  { %p3561_p3 = scmp.lt.u32.totalorder %s3557_s24, %s3812_s2 }
  0x29   :  { %p3563_p4 = pnand %p3561_p3, %p3558_p2 }
  0x2b   :  { %3566 = shalt.err (!%p3563_p4)
}
  0x2c   :  { %s3567_s29 = scalar_lea.vmem %s44_s21, 32768  ;;  %p3572_p6 = scmp.lt.s32.totalorder %s44_s21, %s44_s21 }
  0x2d   :  { %p3568_p5 = scmp.ne.s32.totalorder %s44_s21, %s3567_s29  ;;  %p3573_p7 = scmp.lt.s32.totalorder %s3567_s29, %s3567_s29 }
  0x2f   :  { %p3574_p8 = por %p3573_p7, %p3572_p6 }
  0x31   :  { %p3575_p9 = pnand %p3574_p8, %p3568_p5 }
  0x33   :  { %3578 = shalt.err (!%p3575_p9)
}
  0x34   :  { %s3638_s0 = smov 256   ;;  %s3639_s30 = smov 16  }
  0x35   :  { %49 = dma.hbm_to_vmem [thread:$0]  %s3812_s2, 32768, %s44_s21, [#allocation6], %s3638_s0, %s3638_s0, %s3639_s30  }
  0x36   :  { %s3640_s8 = smov [#allocation8]   ;;  %s3579_s12 = scalar_lea.hbm %s3813_s3, 4096 }
  0x37   :  { %s55_s9 = sshll.u32 %s3640_s8, 4  ;;  %p3580_p10 = scmp.ne.s32.totalorder %s3813_s3, %s3579_s12  ;;  %s56_s9 = int_to_ptr.vmem [resolvable:$true] %s55_s9 }
  0x38   :  { %p3583_p11 = scmp.lt.u32.totalorder %s3579_s12, %s3813_s3 }
  0x3a   :  { %p3585_p12 = pnand %p3583_p11, %p3580_p10 }
  0x3c   :  { %3588 = shalt.err (!%p3585_p12)
}
  0x3d   :  { %s3589_s18 = scalar_lea.vmem %s56_s9, 4096  ;;  %p3594_p0 = scmp.lt.s32.totalorder %s56_s9, %s56_s9 }
  0x3e   :  { %p3590_p13 = scmp.ne.s32.totalorder %s56_s9, %s3589_s18  ;;  %p3595_p1 = scmp.lt.s32.totalorder %s3589_s18, %s3589_s18 }
  0x40   :  { %p3596_p2 = por %p3595_p1, %p3594_p0 }
  0x42   :  { %p3597_p3 = pnand %p3596_p2, %p3590_p13 }
  0x44   :  { %3600 = shalt.err (!%p3597_p3)
}
  0x45   :  { %s3641_s2 = smov 64   ;;  %s3642_s19 = smov 4  }
  0x46   :  { %61 = dma.hbm_to_vmem [thread:$0]  %s3813_s3, 4096, %s56_s9, [#allocation9], %s3641_s2, %s3641_s2, %s3642_s19  }
  0x47   :  { %3623 = dma.done.wait [#allocation3], 256  }
  0x48   :  { %3624 = vsyncadd [#allocation3], 4294967040 }
  0x49   :  { %3625 = dma.done.wait [#allocation6], 34816  }
  0x4a   :  { %3626 = vsyncadd [#allocation6], 4294932480 }
  0x4b   :  { %3627 = dma.done.wait [#allocation9], 4096  }
  0x4c   :  { %3628 = vsyncadd [#allocation9], 4294963200  ;;  %v3643_v0 = vmov 0   ;;  %v80_v1 = vld [vmem:[#allocation5] sm:$0xff]  ;;  %v81_v8 = vld [vmem:[#allocation5 + $0x8] sm:$0xff]  ;;  %vm218_vm0 = vcmask 261120  }
  0x4d   :  { %254 = vmatprep.mubr.bf16.mxu0 %v3643_v0  ;;  %297 = vmatprep.mubr.bf16.mxu1 %v3643_v0  ;;  %v84_v2 = vld [vmem:[#allocation5 + $0x20] sm:$0xff]  ;;  %v85_v9 = vld [vmem:[#allocation5 + $0x28] sm:$0xff]  ;;  %v82_v14 = vld [vmem:[#allocation5 + $0x10] sm:$0xff]  ;;  %s3644_s27 = smov [#allocation10]  }
  0x4e   :  { %v88_v3 = vld [vmem:[#allocation5 + $0x40] sm:$0xff]  ;;  %v2699_v4 = vcombine.high %v80_v1, %v84_v2  ;;  %v2698_v5 = vcombine.low %v80_v1, %v84_v2  ;;  %v89_v10 = vld [vmem:[#allocation5 + $0x48] sm:$0xff]  ;;  %v2701_v11 = vcombine.high %v81_v8, %v85_v9  ;;  %v2700_v12 = vcombine.low %v81_v8, %v85_v9  ;;  %v86_v15 = vld [vmem:[#allocation5 + $0x30] sm:$0xff]  ;;  %s2684_s28 = sshll.u32 %s3644_s27, 4  ;;  %s2685_s28 = int_to_ptr.vmem [resolvable:$true] %s2684_s28 }
  0x4f   :  { %v92_v6 = vld [vmem:[#allocation5 + $0x60] sm:$0xff]  ;;  %v93_v13 = vld [vmem:[#allocation5 + $0x68] sm:$0xff]  ;;  %v77_v17 = vld [vmem:[#allocation2] sm:$0xff]  ;;  %v2703_v21 = vcombine.high %v82_v14, %v86_v15  ;;  %v2702_v28 = vcombine.low %v82_v14, %v86_v15  ;;  %p3606_p5 = scmp.lt.s32.totalorder %s2685_s28, %s2685_s28 }
  0x50   :  { %v2707_v7 = vcombine.high %v88_v3, %v92_v6  ;;  %222 = vmatprep.subr.bf16.mxu0 %v2699_v4  ;;  %v2706_v16 = vcombine.low %v88_v3, %v92_v6  ;;  %v78_v18 = vld [vmem:[#allocation2 + $0x8] sm:$0xff]  ;;  %v2709_v19 = vcombine.high %v89_v10, %v93_v13  ;;  %265 = vmatprep.subr.bf16.mxu1 %v2701_v11  ;;  %v90_v22 = vld [vmem:[#allocation5 + $0x50] sm:$0xff] }
  0x51   :  { %223 = vmatpush1.bf16.msra.mxu0 %v2698_v5  ;;  %v83_v20 = vld [vmem:[#allocation5 + $0x18] sm:$0xff]  ;;  %266 = vmatpush1.bf16.msra.mxu1 %v2700_v12  ;;  %v2708_v24 = vcombine.low %v89_v10, %v93_v13  ;;  %v94_v25 = vld [vmem:[#allocation5 + $0x70] sm:$0xff]  ;;  %v79_v26 = vpack.c.bf16 %v78_v18, %v77_v17 }
  0x52   :  { %224 = vmatprep.subr.bf16.mxu0 %v2707_v7  ;;  %v87_v23 = vld [vmem:[#allocation5 + $0x38] sm:$0xff]  ;;  %267 = vmatprep.subr.bf16.mxu1 %v2709_v19  ;;  %v2711_v31 = vcombine.high %v90_v22, %v94_v25  ;;  %v2710_v34 = vcombine.low %v90_v22, %v94_v25  ;;  %v3099_v35 = vld [vmem:[#allocation7 + $0x4] ss:$16 sps:$4 sm:$0xff]   ;;  %v3097_v38 = vld [vmem:[#allocation7] ss:$16 sps:$4 sm:$0xff]  }
  0x53   :  { %v2705_v27 = vcombine.high %v83_v20, %v87_v23  ;;  %v91_v29 = vld [vmem:[#allocation5 + $0x58] sm:$0xff]  ;;  %v2704_v32 = vcombine.low %v83_v20, %v87_v23  ;;  %v3105_v39 = vld [vmem:[#allocation7 + $0x24] ss:$16 sps:$4 sm:$0xff]   ;;  %v3103_v42 = vld [vmem:[#allocation7 + $0x20] ss:$16 sps:$4 sm:$0xff]  }
  0x54   :  { %v95_v30 = vld [vmem:[#allocation5 + $0x78] sm:$0xff]  ;;  %v3111_v43 = vld [vmem:[#allocation7 + $0x44] ss:$16 sps:$4 sm:$0xff]   ;;  %v3109_v46 = vld [vmem:[#allocation7 + $0x40] ss:$16 sps:$4 sm:$0xff]  }
  0x55   :  { %225 = vmatpush1.bf16.msra.mxu0 %v2706_v16  ;;  %268 = vmatpush1.bf16.msra.mxu1 %v2708_v24  ;;  %v2713_v33 = vcombine.high %v91_v29, %v95_v30  ;;  %v2712_v36 = vcombine.low %v91_v29, %v95_v30  ;;  %v3102_v37 = vld [vmem:[#allocation7 + $0xc] ss:$16 sps:$4 sm:$0xff]   ;;  %v3100_v40 = vld [vmem:[#allocation7 + $0x8] ss:$16 sps:$4 sm:$0xff]   ;;  %v3117_v47 = vld [vmem:[#allocation7 + $0x64] ss:$16 sps:$4 sm:$0xff]  }
  0x56   :  { %308 = vmatprep.subr.bf16.mxu0 %v2703_v21  ;;  %351 = vmatprep.subr.bf16.mxu1 %v2705_v27  ;;  %v3108_v41 = vld [vmem:[#allocation7 + $0x2c] ss:$16 sps:$4 sm:$0xff]   ;;  %v3106_v44 = vld [vmem:[#allocation7 + $0x28] ss:$16 sps:$4 sm:$0xff]   ;;  %v3115_v50 = vld [vmem:[#allocation7 + $0x60] ss:$16 sps:$4 sm:$0xff]  }
  0x57   :  { %v3114_v45 = vld [vmem:[#allocation7 + $0x4c] ss:$16 sps:$4 sm:$0xff]   ;;  %v3112_v48 = vld [vmem:[#allocation7 + $0x48] ss:$16 sps:$4 sm:$0xff]   ;;  %v3123_v51 = vld [vmem:[#allocation7 + $0x84] ss:$16 sps:$4 sm:$0xff]  }
  0x58   :  { %2714 = vmatmul.mubr.msk.bf16.vlgmr.msra.gmra.mrb[0].mxu0 %vm218_vm0, %v79_v26  ;;  %2715 = vmatmul.mubr.msk.bf16.vlgmr.msra.gmra.mrb[0].mxu1 %vm218_vm0, %v79_v26  ;;  %v3120_v49 = vld [vmem:[#allocation7 + $0x6c] ss:$16 sps:$4 sm:$0xff]   ;;  %v3118_v52 = vld [vmem:[#allocation7 + $0x68] ss:$16 sps:$4 sm:$0xff]   ;;  %v3121_v54 = vld [vmem:[#allocation7 + $0x80] ss:$16 sps:$4 sm:$0xff]  }
  0x59   :  { %309 = vmatpush1.bf16.msra.mxu0 %v2702_v28  ;;  %340 = vmatprep.mubr.bf16.mxu0 %v3643_v0  ;;  %v3126_v53 = vld [vmem:[#allocation7 + $0x8c] ss:$16 sps:$4 sm:$0xff]   ;;  %v3129_v55 = vld [vmem:[#allocation7 + $0xa4] ss:$16 sps:$4 sm:$0xff]   ;;  %v3124_v56 = vld [vmem:[#allocation7 + $0x88] ss:$16 sps:$4 sm:$0xff]  }
  0x5a   :  { %310 = vmatprep.subr.bf16.mxu0 %v2711_v31  ;;  %352 = vmatpush1.bf16.msra.mxu1 %v2704_v32  ;;  %v3132_v57 = vld [vmem:[#allocation7 + $0xac] ss:$16 sps:$4 sm:$0xff]   ;;  %v3127_v58 = vld [vmem:[#allocation7 + $0xa0] ss:$16 sps:$4 sm:$0xff]   ;;  %v3135_v59 = vld [vmem:[#allocation7 + $0xc4] ss:$16 sps:$4 sm:$0xff]  }
  0x5b   :  { %383 = vmatprep.mubr.bf16.mxu1 %v3643_v0  ;;  %353 = vmatprep.subr.bf16.mxu1 %v2713_v33  ;;  %v3130_v60 = vld [vmem:[#allocation7 + $0xa8] ss:$16 sps:$4 sm:$0xff]   ;;  %v3138_v61 = vld [vmem:[#allocation7 + $0xcc] ss:$16 sps:$4 sm:$0xff]   ;;  %v3133_v62 = vld [vmem:[#allocation7 + $0xc0] ss:$16 sps:$4 sm:$0xff]  }
  0x5c   :  { %v3136_v63 = vld [vmem:[#allocation7 + $0xc8] ss:$16 sps:$4 sm:$0xff]   ;;  %v3141_v0 = vld [vmem:[#allocation7 + $0xe4] ss:$16 sps:$4 sm:$0xff]   ;;  %v3139_v1 = vld [vmem:[#allocation7 + $0xe0] ss:$16 sps:$4 sm:$0xff]  }
  0x5d   :  { %311 = vmatpush1.bf16.msra.mxu0 %v2710_v34  ;;  %v3144_v2 = vld [vmem:[#allocation7 + $0xec] ss:$16 sps:$4 sm:$0xff]   ;;  %v3147_v3 = vld [vmem:[#allocation7 + $0x104] ss:$16 sps:$4 sm:$0xff]   ;;  %v3142_v4 = vld [vmem:[#allocation7 + $0xe8] ss:$16 sps:$4 sm:$0xff]  }
  0x5e   :  { %1976 = vmatprep.subr.bf16.mxu0 %v3099_v35  ;;  %354 = vmatpush1.bf16.msra.mxu1 %v2712_v36  ;;  %v3150_v5 = vld [vmem:[#allocation7 + $0x10c] ss:$16 sps:$4 sm:$0xff]   ;;  %v3145_v6 = vld [vmem:[#allocation7 + $0x100] ss:$16 sps:$4 sm:$0xff]   ;;  %v3153_v7 = vld [vmem:[#allocation7 + $0x124] ss:$16 sps:$4 sm:$0xff]  }
  0x5f   :  { %2148 = vmatprep.subr.bf16.mxu1 %v3102_v37  ;;  %v3148_v8 = vld [vmem:[#allocation7 + $0x108] ss:$16 sps:$4 sm:$0xff]   ;;  %v3156_v9 = vld [vmem:[#allocation7 + $0x12c] ss:$16 sps:$4 sm:$0xff]   ;;  %v3151_v10 = vld [vmem:[#allocation7 + $0x120] ss:$16 sps:$4 sm:$0xff]  }
  0x60   :  { %2716 = vmatmul.mubr.msk.bf16.vlgmr.msra.gmra.mrb[4].mxu0 %vm218_vm0, %v79_v26  ;;  %v3159_v11 = vld [vmem:[#allocation7 + $0x144] ss:$16 sps:$4 sm:$0xff]   ;;  %v3154_v12 = vld [vmem:[#allocation7 + $0x128] ss:$16 sps:$4 sm:$0xff]   ;;  %v3162_v13 = vld [vmem:[#allocation7 + $0x14c] ss:$16 sps:$4 sm:$0xff]  }
  0x61   :  { %1977 = vmatpush1.bf16.msra.mxu0 %v3097_v38  ;;  %2717 = vmatmul.mubr.msk.bf16.vlgmr.msra.gmra.mrb[4].mxu1 %vm218_vm0, %v79_v26  ;;  %v3157_v14 = vld [vmem:[#allocation7 + $0x140] ss:$16 sps:$4 sm:$0xff]   ;;  %v3165_v15 = vld [vmem:[#allocation7 + $0x164] ss:$16 sps:$4 sm:$0xff]   ;;  %v3160_v16 = vld [vmem:[#allocation7 + $0x148] ss:$16 sps:$4 sm:$0xff]   ;;  %v98_v38 = vlaneseq }
  0x62   :  { %1978 = vmatprep.subr.bf16.mxu0 %v3105_v39  ;;  %2149 = vmatpush1.bf16.msra.mxu1 %v3100_v40  ;;  %v3168_v17 = vld [vmem:[#allocation7 + $0x16c] ss:$16 sps:$4 sm:$0xff]   ;;  %v3163_v18 = vld [vmem:[#allocation7 + $0x160] ss:$16 sps:$4 sm:$0xff]   ;;  %v3171_v19 = vld [vmem:[#allocation7 + $0x184] ss:$16 sps:$4 sm:$0xff]  }
  0x63   :  { %2150 = vmatprep.subr.bf16.mxu1 %v3108_v41  ;;  %v3166_v20 = vld [vmem:[#allocation7 + $0x168] ss:$16 sps:$4 sm:$0xff]   ;;  %v3174_v21 = vld [vmem:[#allocation7 + $0x18c] ss:$16 sps:$4 sm:$0xff]   ;;  %v3169_v22 = vld [vmem:[#allocation7 + $0x180] ss:$16 sps:$4 sm:$0xff]  }
  0x64   :  { %v3177_v23 = vld [vmem:[#allocation7 + $0x1a4] ss:$16 sps:$4 sm:$0xff]   ;;  %v3172_v24 = vld [vmem:[#allocation7 + $0x188] ss:$16 sps:$4 sm:$0xff]   ;;  %v3180_v25 = vld [vmem:[#allocation7 + $0x1ac] ss:$16 sps:$4 sm:$0xff]  }
  0x65   :  { %1979 = vmatpush1.bf16.msra.mxu0 %v3103_v42  ;;  %v3175_v26 = vld [vmem:[#allocation7 + $0x1a0] ss:$16 sps:$4 sm:$0xff]   ;;  %v3178_v27 = vld [vmem:[#allocation7 + $0x1a8] ss:$16 sps:$4 sm:$0xff]   ;;  %v3183_v28 = vld [vmem:[#allocation7 + $0x1c4] ss:$16 sps:$4 sm:$0xff]  }
  0x66   :  { %1980 = vmatprep.subr.bf16.mxu0 %v3111_v43  ;;  %2151 = vmatpush1.bf16.msra.mxu1 %v3106_v44  ;;  %v3186_v29 = vld [vmem:[#allocation7 + $0x1cc] ss:$16 sps:$4 sm:$0xff]   ;;  %v3181_v30 = vld [vmem:[#allocation7 + $0x1c0] ss:$16 sps:$4 sm:$0xff]   ;;  %v3184_v31 = vld [vmem:[#allocation7 + $0x1c8] ss:$16 sps:$4 sm:$0xff]  }
  0x67   :  { %2152 = vmatprep.subr.bf16.mxu1 %v3114_v45  ;;  %v3189_v32 = vld [vmem:[#allocation7 + $0x1e4] ss:$16 sps:$4 sm:$0xff]   ;;  %v3192_v33 = vld [vmem:[#allocation7 + $0x1ec] ss:$16 sps:$4 sm:$0xff]   ;;  %v3187_v34 = vld [vmem:[#allocation7 + $0x1e0] ss:$16 sps:$4 sm:$0xff]  }
  0x68   :  { %v3190_v35 = vld [vmem:[#allocation7 + $0x1e8] ss:$16 sps:$4 sm:$0xff]   ;;  %v3195_v36 = vld [vmem:[#allocation7 + $0x204] ss:$16 sps:$4 sm:$0xff]   ;;  %v3198_v37 = vld [vmem:[#allocation7 + $0x20c] ss:$16 sps:$4 sm:$0xff]  }
  0x69   :  { %1981 = vmatpush1.bf16.msra.mxu0 %v3109_v46  ;;  %v3730_v39 = vshrl.u32 %v98_v38, 7  ;;  %v3736_v41 = vld [vmem:[%s3814_s4] sm:$0xff] }
  0x6a   :  { %1982 = vmatprep.subr.bf16.mxu0 %v3117_v47  ;;  %2153 = vmatpush1.bf16.msra.mxu1 %v3112_v48  ;;  %v3205_v38 = vld [vmem:[#allocation7 + $0x240] ss:$16 sps:$4 sm:$0xff]  }
  0x6b   :  { %2154 = vmatprep.subr.bf16.mxu1 %v3120_v49  ;;  %v100_v40 = vsub.s32 0, %v3730_v39  ;;  %v104_v42 = vsub.s32 1, %v3730_v39  ;;  %v108_v43 = vsub.s32 2, %v3730_v39  ;;  %v112_v44 = vsub.s32 3, %v3730_v39 }
  0x6d   :  { %1983 = vmatpush1.bf16.msra.mxu0 %v3115_v50  ;;  %v101_v45 = vrot.slane %v3736_v41, %v100_v40  ;;  %v105_v46 = vrot.slane %v3736_v41, %v104_v42  ;;  %v109_v47 = vrot.slane %v3736_v41, %v108_v43  ;;  %v113_v49 = vrot.slane %v3736_v41, %v112_v44 }
  0x6e   :  { %1984 = vmatprep.subr.bf16.mxu0 %v3123_v51  ;;  %2155 = vmatpush1.bf16.msra.mxu1 %v3118_v52  ;;  %v116_v50 = vsub.s32 4, %v3730_v39  ;;  %v120_v51 = vsub.s32 5, %v3730_v39 }
  0x6f   :  { %2156 = vmatprep.subr.bf16.mxu1 %v3126_v53 }
  0x71   :  { %1985 = vmatpush1.bf16.msra.mxu0 %v3121_v54 }
  0x72   :  { %1986 = vmatprep.subr.bf16.mxu0 %v3129_v55  ;;  %2157 = vmatpush1.bf16.msra.mxu1 %v3124_v56 }
  0x73   :  { %2158 = vmatprep.subr.bf16.mxu1 %v3132_v57 }
  0x75   :  { %1987 = vmatpush1.bf16.msra.mxu0 %v3127_v58 }
  0x76   :  { %1988 = vmatprep.subr.bf16.mxu0 %v3135_v59  ;;  %2159 = vmatpush1.bf16.msra.mxu1 %v3130_v60 }
  0x77   :  { %2160 = vmatprep.subr.bf16.mxu1 %v3138_v61 }
  0x79   :  { %1989 = vmatpush1.bf16.msra.mxu0 %v3133_v62 }
  0x7a   :  { %1990 = vmatprep.subr.bf16.mxu0 %v3141_v0  ;;  %2161 = vmatpush1.bf16.msra.mxu1 %v3136_v63  ;;  %v117_v0 = vrot.slane %v3736_v41, %v116_v50  ;;  %v3214_v50 = vld [vmem:[#allocation7 + $0x268] ss:$16 sps:$4 sm:$0xff]  }
  0x7b   :  { %2162 = vmatprep.subr.bf16.mxu1 %v3144_v2 }
  0x7d   :  { %1991 = vmatpush1.bf16.msra.mxu0 %v3139_v1  ;;  %v121_v1 = vrot.slane %v3736_v41, %v120_v51  ;;  %v3219_v51 = vld [vmem:[#allocation7 + $0x284] ss:$16 sps:$4 sm:$0xff]  }
  0x7e   :  { %1992 = vmatprep.subr.bf16.mxu0 %v3147_v3  ;;  %2163 = vmatpush1.bf16.msra.mxu1 %v3142_v4 }
  0x7f   :  { %2164 = vmatprep.subr.bf16.mxu1 %v3150_v5 }
  0x81   :  { %1993 = vmatpush1.bf16.msra.mxu0 %v3145_v6 }
  0x82   :  { %1994 = vmatprep.subr.bf16.mxu0 %v3153_v7  ;;  %2165 = vmatpush1.bf16.msra.mxu1 %v3148_v8 }
  0x83   :  { %2166 = vmatprep.subr.bf16.mxu1 %v3156_v9 }
  0x85   :  { %1995 = vmatpush1.bf16.msra.mxu0 %v3151_v10 }
  0x86   :  { %1996 = vmatprep.subr.bf16.mxu0 %v3159_v11  ;;  %2167 = vmatpush1.bf16.msra.mxu1 %v3154_v12 }
  0x87   :  { %2168 = vmatprep.subr.bf16.mxu1 %v3162_v13 }
  0x89   :  { %1997 = vmatpush1.bf16.msra.mxu0 %v3157_v14  ;;  %v3193_v14 = vld [vmem:[#allocation7 + $0x200] ss:$16 sps:$4 sm:$0xff]  }
  0x8a   :  { %1998 = vmatprep.subr.bf16.mxu0 %v3165_v15  ;;  %2169 = vmatpush1.bf16.msra.mxu1 %v3160_v16  ;;  %v3196_v15 = vld [vmem:[#allocation7 + $0x208] ss:$16 sps:$4 sm:$0xff]  }
  0x8b   :  { %2170 = vmatprep.subr.bf16.mxu1 %v3168_v17 }
  0x8d   :  { %1999 = vmatpush1.bf16.msra.mxu0 %v3163_v18  ;;  %v3201_v18 = vld [vmem:[#allocation7 + $0x224] ss:$16 sps:$4 sm:$0xff]  }
  0x8e   :  { %2000 = vmatprep.subr.bf16.mxu0 %v3171_v19  ;;  %2171 = vmatpush1.bf16.msra.mxu1 %v3166_v20  ;;  %v3204_v19 = vld [vmem:[#allocation7 + $0x22c] ss:$16 sps:$4 sm:$0xff]  }
  0x8f   :  { %2172 = vmatprep.subr.bf16.mxu1 %v3174_v21 }
  0x91   :  { %2001 = vmatpush1.bf16.msra.mxu0 %v3169_v22 }
  0x92   :  { %2002 = vmatprep.subr.bf16.mxu0 %v3177_v23  ;;  %2173 = vmatpush1.bf16.msra.mxu1 %v3172_v24 }
  0x93   :  { %2174 = vmatprep.subr.bf16.mxu1 %v3180_v25 }
  0x95   :  { %2003 = vmatpush1.bf16.msra.mxu0 %v3175_v26 }
  0x96   :  { %2175 = vmatpush1.bf16.msra.mxu1 %v3178_v27  ;;  %2004 = vmatprep.subr.bf16.mxu0 %v3183_v28 }
  0x97   :  { %2176 = vmatprep.subr.bf16.mxu1 %v3186_v29  ;;  %v3199_v29 = vld [vmem:[#allocation7 + $0x220] ss:$16 sps:$4 sm:$0xff]  }
  0x99   :  { %2005 = vmatpush1.bf16.msra.mxu0 %v3181_v30  ;;  %v3202_v30 = vld [vmem:[#allocation7 + $0x228] ss:$16 sps:$4 sm:$0xff]  }
  0x9a   :  { %2177 = vmatpush1.bf16.msra.mxu1 %v3184_v31  ;;  %2006 = vmatprep.subr.bf16.mxu0 %v3189_v32 }
  0x9b   :  { %2178 = vmatprep.subr.bf16.mxu1 %v3192_v33  ;;  %v3207_v33 = vld [vmem:[#allocation7 + $0x244] ss:$16 sps:$4 sm:$0xff]  }
  0x9d   :  { %2007 = vmatpush1.bf16.msra.mxu0 %v3187_v34  ;;  %v3210_v34 = vld [vmem:[#allocation7 + $0x24c] ss:$16 sps:$4 sm:$0xff]  }
  0x9e   :  { %2179 = vmatpush1.bf16.msra.mxu1 %v3190_v35  ;;  %2019 = vmatprep.subr.bf16.mxu0 %v3195_v36 }
  0x9f   :  { %2191 = vmatprep.subr.bf16.mxu1 %v3198_v37 }
 0x12b   :  { %v256_v48 = vpop.f32.mrb[0].mxu0  ;;  %v299_v56 = vpop.f32.mrb[0].mxu1 }
 0x12c   :  { %v257_v52 = vadd.f32 %v256_v48, %v101_v45  ;;  %v258_v53 = vpop.f32.mrb[1].mxu0  ;;  %v300_v59 = vadd.f32 %v299_v56, %v109_v47  ;;  %v301_v60 = vpop.f32.mrb[1].mxu1  ;;  %v3216_v48 = vld [vmem:[#allocation7 + $0x26c] ss:$16 sps:$4 sm:$0xff]  }
 0x12d   :  { %v259_v54 = vadd.f32 %v258_v53, %v105_v46  ;;  %v260_v55 = vpop.f32.mrb[2].mxu0  ;;  %v302_v62 = vadd.f32 %v301_v60, %v113_v49  ;;  %v303_v63 = vpop.f32.mrb[2].mxu1  ;;  %v3217_v53 = vld [vmem:[#allocation7 + $0x280] ss:$16 sps:$4 sm:$0xff]   ;;  %v3228_v56 = vld [vmem:[#allocation7 + $0x2ac] ss:$16 sps:$4 sm:$0xff]  }
 0x12e   :  { %v261_v57 = vadd.f32 %v260_v55, %v101_v45  ;;  %v262_v58 = vpop.f32.mrb[3].mxu0  ;;  %v394_v2 = vmax.f32 %v257_v52, 0.0  ;;  %v396_v4 = vmax.f32 %v300_v59, 0.0  ;;  %v304_v5 = vadd.f32 %v303_v63, %v109_v47  ;;  %v305_v6 = vpop.f32.mrb[3].mxu1  ;;  %v3208_v45 = vld [vmem:[#allocation7 + $0x248] ss:$16 sps:$4 sm:$0xff]  }
 0x12f   :  { %v263_v61 = vadd.f32 %v262_v58, %v105_v46  ;;  %v395_v7 = vmax.f32 %v259_v54, 0.0  ;;  %v397_v9 = vmax.f32 %v302_v62, 0.0  ;;  %v306_v10 = vadd.f32 %v305_v6, %v113_v49  ;;  %v3213_v47 = vld [vmem:[#allocation7 + $0x264] ss:$16 sps:$4 sm:$0xff]   ;;  %v3211_v49 = vld [vmem:[#allocation7 + $0x260] ss:$16 sps:$4 sm:$0xff]  }
 0x130   :  { %v402_v3 = vmax.f32 %v261_v57, 0.0  ;;  %v404_v12 = vmax.f32 %v304_v5, 0.0  ;;  %v3222_v52 = vld [vmem:[#allocation7 + $0x28c] ss:$16 sps:$4 sm:$0xff]   ;;  %v3220_v54 = vld [vmem:[#allocation7 + $0x288] ss:$16 sps:$4 sm:$0xff]  }
 0x131   :  { %v403_v8 = vmax.f32 %v263_v61, 0.0  ;;  %v405_v16 = vmax.f32 %v306_v10, 0.0  ;;  %v3225_v55 = vld [vmem:[#allocation7 + $0x2a4] ss:$16 sps:$4 sm:$0xff]   ;;  %v3223_v57 = vld [vmem:[#allocation7 + $0x2a0] ss:$16 sps:$4 sm:$0xff]  }
 0x132   :  { %v410_v11 = vpack.c.bf16 %v402_v3, %v394_v2  ;;  %v3757_v20 = vpack.c.bf16 %v404_v12, %v396_v4  ;;  %v3226_v58 = vld [vmem:[#allocation7 + $0x2a8] ss:$16 sps:$4 sm:$0xff]   ;;  %v124_v59 = vsub.s32 6, %v3730_v39  ;;  %v128_v61 = vsub.s32 7, %v3730_v39  ;;  %v3231_v62 = vld [vmem:[#allocation7 + $0x2c4] ss:$16 sps:$4 sm:$0xff]  }
 0x133   :  { %v411_v13 = vpack.c.bf16 %v403_v8, %v395_v7  ;;  %v342_v17 = vpop.f32.mrb[4].mxu0  ;;  %v413_v23 = vpack.c.bf16 %v405_v16, %v397_v9  ;;  %v3234_v63 = vld [vmem:[#allocation7 + $0x2cc] ss:$16 sps:$4 sm:$0xff]   ;;  %v3229_v4 = vld [vmem:[#allocation7 + $0x2c0] ss:$16 sps:$4 sm:$0xff]  }
 0x134   :  { %v343_v21 = vadd.f32 %v342_v17, %v117_v0  ;;  %v344_v22 = vpop.f32.mrb[5].mxu0  ;;  %v385_v60 = vpop.f32.mrb[4].mxu1  ;;  %v129_v2 = vrot.slane %v3736_v41, %v128_v61  ;;  %v3232_v5 = vld [vmem:[#allocation7 + $0x2c8] ss:$16 sps:$4 sm:$0xff]   ;;  %v3237_v10 = vld [vmem:[#allocation7 + $0x2e4] ss:$16 sps:$4 sm:$0xff]  }
 0x135   :  { %2008 = vmatprep.mubr.bf16.mxu0 %v411_v13  ;;  %2180 = vmatprep.mubr.bf16.mxu1 %v411_v13  ;;  %v345_v24 = vadd.f32 %v344_v22, %v121_v1  ;;  %v346_v25 = vpop.f32.mrb[6].mxu0  ;;  %v3238_v17 = vld [vmem:[#allocation7 + $0x2e8] ss:$16 sps:$4 sm:$0xff]   ;;  %v3291_v61 = vld [vmem:[#allocation7 + $0x404] ss:$16 sps:$4 sm:$0xff]  }
 0x136   :  { %2009 = vmatmul.mubr.bf16.vlgmr.msra.gmra.mrb[8].mxu0 %v410_v11  ;;  %2181 = vmatmul.mubr.bf16.vlgmr.msra.gmra.mrb[8].mxu1 %v410_v11  ;;  %v398_v26 = vmax.f32 %v343_v21, 0.0  ;;  %v347_v27 = vadd.f32 %v346_v25, %v117_v0  ;;  %v348_v28 = vpop.f32.mrb[7].mxu0  ;;  %v387_v0 = vpop.f32.mrb[5].mxu1  ;;  %v3240_v11 = vld [vmem:[#allocation7 + $0x2ec] ss:$16 sps:$4 sm:$0xff]  }
 0x137   :  { %2020 = vmatpush1.bf16.msra.mxu0 %v3193_v14  ;;  %2192 = vmatpush1.bf16.msra.mxu1 %v3196_v15  ;;  %v399_v31 = vmax.f32 %v345_v24, 0.0  ;;  %v349_v32 = vadd.f32 %v348_v28, %v121_v1  ;;  %v125_v1 = vrot.slane %v3736_v41, %v124_v59  ;;  %v389_v3 = vpop.f32.mrb[6].mxu1  ;;  %v388_v7 = vadd.f32 %v387_v0, %v129_v2  ;;  %v3235_v41 = vld [vmem:[#allocation7 + $0x2e0] ss:$16 sps:$4 sm:$0xff]   ;;  %v3246_v21 = vld [vmem:[#allocation7 + $0x30c] ss:$16 sps:$4 sm:$0xff]  }
 0x138   :  { %2021 = vmatprep.subr.bf16.mxu0 %v3201_v18  ;;  %2193 = vmatprep.subr.bf16.mxu1 %v3204_v19  ;;  %v406_v35 = vmax.f32 %v347_v27, 0.0  ;;  %v391_v9 = vpop.f32.mrb[7].mxu1  ;;  %v3243_v19 = vld [vmem:[#allocation7 + $0x304] ss:$16 sps:$4 sm:$0xff]   ;;  %v3244_v24 = vld [vmem:[#allocation7 + $0x308] ss:$16 sps:$4 sm:$0xff]  }
 0x139   :  { %2051 = vmatprep.mubr.bf16.mxu0 %v413_v23  ;;  %2223 = vmatprep.mubr.bf16.mxu1 %v413_v23  ;;  %v407_v36 = vmax.f32 %v349_v32, 0.0  ;;  %v386_v6 = vadd.f32 %v385_v60, %v125_v1  ;;  %v390_v8 = vadd.f32 %v389_v3, %v125_v1  ;;  %v392_v12 = vadd.f32 %v391_v9, %v129_v2  ;;  %v3241_v23 = vld [vmem:[#allocation7 + $0x300] ss:$16 sps:$4 sm:$0xff]   ;;  %v3249_v25 = vld [vmem:[#allocation7 + $0x324] ss:$16 sps:$4 sm:$0xff]  }
 0x13a   :  { %v3759_v37 = vpack.c.bf16 %v406_v35, %v398_v26  ;;  %v401_v14 = vmax.f32 %v388_v7, 0.0  ;;  %v3252_v26 = vld [vmem:[#allocation7 + $0x32c] ss:$16 sps:$4 sm:$0xff]   ;;  %v3247_v27 = vld [vmem:[#allocation7 + $0x320] ss:$16 sps:$4 sm:$0xff]  }
 0x13b   :  { %2022 = vmatpush1.bf16.msra.mxu0 %v3199_v29  ;;  %2194 = vmatpush1.bf16.msra.mxu1 %v3202_v30  ;;  %v3761_v46 = vpack.c.bf16 %v407_v36, %v399_v31  ;;  %v400_v13 = vmax.f32 %v386_v6, 0.0  ;;  %v408_v15 = vmax.f32 %v390_v8, 0.0  ;;  %v409_v16 = vmax.f32 %v392_v12, 0.0  ;;  %v3250_v28 = vld [vmem:[#allocation7 + $0x328] ss:$16 sps:$4 sm:$0xff]  }
 0x13c   :  { %2023 = vmatprep.subr.bf16.mxu0 %v3207_v33  ;;  %2195 = vmatprep.subr.bf16.mxu1 %v3210_v34  ;;  %v3255_v29 = vld [vmem:[#allocation7 + $0x344] ss:$16 sps:$4 sm:$0xff]   ;;  %v3258_v30 = vld [vmem:[#allocation7 + $0x34c] ss:$16 sps:$4 sm:$0xff]   ;;  %v3253_v31 = vld [vmem:[#allocation7 + $0x340] ss:$16 sps:$4 sm:$0xff]  }
 0x13d   :  { %v3767_v18 = vpack.c.bf16 %v408_v15, %v400_v13  ;;  %v3769_v22 = vpack.c.bf16 %v409_v16, %v401_v14  ;;  %v3256_v32 = vld [vmem:[#allocation7 + $0x348] ss:$16 sps:$4 sm:$0xff]   ;;  %v3261_v33 = vld [vmem:[#allocation7 + $0x364] ss:$16 sps:$4 sm:$0xff]   ;;  %v3264_v34 = vld [vmem:[#allocation7 + $0x36c] ss:$16 sps:$4 sm:$0xff]  }
 0x13e   :  { %v3259_v35 = vld [vmem:[#allocation7 + $0x360] ss:$16 sps:$4 sm:$0xff]   ;;  %v3262_v36 = vld [vmem:[#allocation7 + $0x368] ss:$16 sps:$4 sm:$0xff]   ;;  %v3297_v1 = vld [vmem:[#allocation7 + $0x424] ss:$16 sps:$4 sm:$0xff]  }
 0x13f   :  { %2024 = vmatpush1.bf16.msra.mxu0 %v3205_v38  ;;  %2196 = vmatpush1.bf16.msra.mxu1 %v3208_v45  ;;  %v3267_v38 = vld [vmem:[#allocation7 + $0x384] ss:$16 sps:$4 sm:$0xff]   ;;  %v3270_v45 = vld [vmem:[#allocation7 + $0x38c] ss:$16 sps:$4 sm:$0xff]   ;;  %v3283_v59 = vld [vmem:[#allocation7 + $0x3e0] ss:$16 sps:$4 sm:$0xff]  }
 0x140   :  { %2025 = vmatprep.subr.bf16.mxu0 %v3213_v47  ;;  %2197 = vmatprep.subr.bf16.mxu1 %v3216_v48  ;;  %v3265_v47 = vld [vmem:[#allocation7 + $0x380] ss:$16 sps:$4 sm:$0xff]   ;;  %v3268_v48 = vld [vmem:[#allocation7 + $0x388] ss:$16 sps:$4 sm:$0xff]   ;;  %v3300_v2 = vld [vmem:[#allocation7 + $0x42c] ss:$16 sps:$4 sm:$0xff]  }
 0x141   :  { %v3286_v60 = vld [vmem:[#allocation7 + $0x3e8] ss:$16 sps:$4 sm:$0xff]   ;;  %v3295_v3 = vld [vmem:[#allocation7 + $0x420] ss:$16 sps:$4 sm:$0xff]   ;;  %v3306_v6 = vld [vmem:[#allocation7 + $0x44c] ss:$16 sps:$4 sm:$0xff]  }
 0x142   :  { %v3292_v0 = vld [vmem:[#allocation7 + $0x408] ss:$16 sps:$4 sm:$0xff]   ;;  %v3301_v7 = vld [vmem:[#allocation7 + $0x440] ss:$16 sps:$4 sm:$0xff]   ;;  %v3309_v9 = vld [vmem:[#allocation7 + $0x464] ss:$16 sps:$4 sm:$0xff]  }
 0x143   :  { %2026 = vmatpush1.bf16.msra.mxu0 %v3211_v49  ;;  %2198 = vmatpush1.bf16.msra.mxu1 %v3214_v50  ;;  %v3273_v49 = vld [vmem:[#allocation7 + $0x3a4] ss:$16 sps:$4 sm:$0xff]   ;;  %v3276_v50 = vld [vmem:[#allocation7 + $0x3ac] ss:$16 sps:$4 sm:$0xff]   ;;  %v3304_v8 = vld [vmem:[#allocation7 + $0x448] ss:$16 sps:$4 sm:$0xff]  }
 0x144   :  { %2027 = vmatprep.subr.bf16.mxu0 %v3219_v51  ;;  %2199 = vmatprep.subr.bf16.mxu1 %v3222_v52  ;;  %v3271_v51 = vld [vmem:[#allocation7 + $0x3a0] ss:$16 sps:$4 sm:$0xff]   ;;  %v3274_v52 = vld [vmem:[#allocation7 + $0x3a8] ss:$16 sps:$4 sm:$0xff]   ;;  %v3315_v12 = vld [vmem:[#allocation7 + $0x484] ss:$16 sps:$4 sm:$0xff]  }
 0x145   :  { %v3318_v13 = vld [vmem:[#allocation7 + $0x48c] ss:$16 sps:$4 sm:$0xff]   ;;  %v3313_v14 = vld [vmem:[#allocation7 + $0x480] ss:$16 sps:$4 sm:$0xff]   ;;  %v3321_v15 = vld [vmem:[#allocation7 + $0x4a4] ss:$16 sps:$4 sm:$0xff]  }
 0x146   :  { %v3324_v16 = vld [vmem:[#allocation7 + $0x4ac] ss:$16 sps:$4 sm:$0xff]  }
 0x147   :  { %2028 = vmatpush1.bf16.msra.mxu0 %v3217_v53  ;;  %2200 = vmatpush1.bf16.msra.mxu1 %v3220_v54  ;;  %v3279_v53 = vld [vmem:[#allocation7 + $0x3c4] ss:$16 sps:$4 sm:$0xff]   ;;  %v3282_v54 = vld [vmem:[#allocation7 + $0x3cc] ss:$16 sps:$4 sm:$0xff]  }
 0x148   :  { %2029 = vmatprep.subr.bf16.mxu0 %v3225_v55  ;;  %2201 = vmatprep.subr.bf16.mxu1 %v3228_v56  ;;  %v3277_v55 = vld [vmem:[#allocation7 + $0x3c0] ss:$16 sps:$4 sm:$0xff]   ;;  %v3280_v56 = vld [vmem:[#allocation7 + $0x3c8] ss:$16 sps:$4 sm:$0xff]  }
 0x14b   :  { %2030 = vmatpush1.bf16.msra.mxu0 %v3223_v57  ;;  %2202 = vmatpush1.bf16.msra.mxu1 %v3226_v58  ;;  %v3285_v57 = vld [vmem:[#allocation7 + $0x3e4] ss:$16 sps:$4 sm:$0xff]   ;;  %v3288_v58 = vld [vmem:[#allocation7 + $0x3ec] ss:$16 sps:$4 sm:$0xff]  }
 0x14c   :  { %2031 = vmatprep.subr.bf16.mxu0 %v3231_v62  ;;  %2203 = vmatprep.subr.bf16.mxu1 %v3234_v63  ;;  %v3294_v62 = vld [vmem:[#allocation7 + $0x40c] ss:$16 sps:$4 sm:$0xff]   ;;  %v3289_v63 = vld [vmem:[#allocation7 + $0x400] ss:$16 sps:$4 sm:$0xff]  }
 0x14f   :  { %2032 = vmatpush1.bf16.msra.mxu0 %v3229_v4  ;;  %2204 = vmatpush1.bf16.msra.mxu1 %v3232_v5  ;;  %v3298_v4 = vld [vmem:[#allocation7 + $0x428] ss:$16 sps:$4 sm:$0xff]   ;;  %v3303_v5 = vld [vmem:[#allocation7 + $0x444] ss:$16 sps:$4 sm:$0xff]  }
 0x150   :  { %2033 = vmatprep.subr.bf16.mxu0 %v3237_v10  ;;  %2205 = vmatprep.subr.bf16.mxu1 %v3240_v11  ;;  %v3307_v10 = vld [vmem:[#allocation7 + $0x460] ss:$16 sps:$4 sm:$0xff]   ;;  %v3310_v11 = vld [vmem:[#allocation7 + $0x468] ss:$16 sps:$4 sm:$0xff]  }
 0x153   :  { %2034 = vmatpush1.bf16.msra.mxu0 %v3235_v41  ;;  %2206 = vmatpush1.bf16.msra.mxu1 %v3238_v17  ;;  %v3319_v41 = vld [vmem:[#allocation7 + $0x4a0] ss:$16 sps:$4 sm:$0xff]   ;;  %v3322_v17 = vld [vmem:[#allocation7 + $0x4a8] ss:$16 sps:$4 sm:$0xff]  }
 0x154   :  { %2035 = vmatprep.subr.bf16.mxu0 %v3243_v19  ;;  %2207 = vmatprep.subr.bf16.mxu1 %v3246_v21  ;;  %v3327_v19 = vld [vmem:[#allocation7 + $0x4c4] ss:$16 sps:$4 sm:$0xff]   ;;  %v3330_v21 = vld [vmem:[#allocation7 + $0x4cc] ss:$16 sps:$4 sm:$0xff]  }
 0x157   :  { %2036 = vmatpush1.bf16.msra.mxu0 %v3241_v23  ;;  %2208 = vmatpush1.bf16.msra.mxu1 %v3244_v24  ;;  %v3325_v23 = vld [vmem:[#allocation7 + $0x4c0] ss:$16 sps:$4 sm:$0xff]   ;;  %v3328_v24 = vld [vmem:[#allocation7 + $0x4c8] ss:$16 sps:$4 sm:$0xff]  }
 0x158   :  { %2037 = vmatprep.subr.bf16.mxu0 %v3249_v25  ;;  %2209 = vmatprep.subr.bf16.mxu1 %v3252_v26  ;;  %v3333_v25 = vld [vmem:[#allocation7 + $0x4e4] ss:$16 sps:$4 sm:$0xff]   ;;  %v3336_v26 = vld [vmem:[#allocation7 + $0x4ec] ss:$16 sps:$4 sm:$0xff]  }
 0x15b   :  { %2038 = vmatpush1.bf16.msra.mxu0 %v3247_v27  ;;  %2210 = vmatpush1.bf16.msra.mxu1 %v3250_v28  ;;  %v3331_v27 = vld [vmem:[#allocation7 + $0x4e0] ss:$16 sps:$4 sm:$0xff]   ;;  %v3334_v28 = vld [vmem:[#allocation7 + $0x4e8] ss:$16 sps:$4 sm:$0xff]  }
 0x15c   :  { %2039 = vmatprep.subr.bf16.mxu0 %v3255_v29  ;;  %2211 = vmatprep.subr.bf16.mxu1 %v3258_v30  ;;  %v3339_v29 = vld [vmem:[#allocation7 + $0x504] ss:$16 sps:$4 sm:$0xff]   ;;  %v3342_v30 = vld [vmem:[#allocation7 + $0x50c] ss:$16 sps:$4 sm:$0xff]  }
 0x15f   :  { %2040 = vmatpush1.bf16.msra.mxu0 %v3253_v31  ;;  %2212 = vmatpush1.bf16.msra.mxu1 %v3256_v32  ;;  %v3337_v31 = vld [vmem:[#allocation7 + $0x500] ss:$16 sps:$4 sm:$0xff]   ;;  %v3340_v32 = vld [vmem:[#allocation7 + $0x508] ss:$16 sps:$4 sm:$0xff]  }
 0x160   :  { %2041 = vmatprep.subr.bf16.mxu0 %v3261_v33  ;;  %2213 = vmatprep.subr.bf16.mxu1 %v3264_v34  ;;  %v3345_v33 = vld [vmem:[#allocation7 + $0x524] ss:$16 sps:$4 sm:$0xff]   ;;  %v3348_v34 = vld [vmem:[#allocation7 + $0x52c] ss:$16 sps:$4 sm:$0xff]  }
 0x163   :  { %2042 = vmatpush1.bf16.msra.mxu0 %v3259_v35  ;;  %2214 = vmatpush1.bf16.msra.mxu1 %v3262_v36  ;;  %v3343_v35 = vld [vmem:[#allocation7 + $0x520] ss:$16 sps:$4 sm:$0xff]   ;;  %v3346_v36 = vld [vmem:[#allocation7 + $0x528] ss:$16 sps:$4 sm:$0xff]  }
 0x164   :  { %2043 = vmatprep.subr.bf16.mxu0 %v3267_v38  ;;  %2215 = vmatprep.subr.bf16.mxu1 %v3270_v45  ;;  %v3351_v38 = vld [vmem:[#allocation7 + $0x544] ss:$16 sps:$4 sm:$0xff]   ;;  %v3354_v45 = vld [vmem:[#allocation7 + $0x54c] ss:$16 sps:$4 sm:$0xff]  }
 0x167   :  { %2044 = vmatpush1.bf16.msra.mxu0 %v3265_v47  ;;  %2216 = vmatpush1.bf16.msra.mxu1 %v3268_v48  ;;  %v3349_v47 = vld [vmem:[#allocation7 + $0x540] ss:$16 sps:$4 sm:$0xff]   ;;  %v3352_v48 = vld [vmem:[#allocation7 + $0x548] ss:$16 sps:$4 sm:$0xff]  }
 0x168   :  { %2045 = vmatprep.subr.bf16.mxu0 %v3273_v49  ;;  %2217 = vmatprep.subr.bf16.mxu1 %v3276_v50  ;;  %v3357_v49 = vld [vmem:[#allocation7 + $0x564] ss:$16 sps:$4 sm:$0xff]   ;;  %v3360_v50 = vld [vmem:[#allocation7 + $0x56c] ss:$16 sps:$4 sm:$0xff]  }
 0x16b   :  { %2046 = vmatpush1.bf16.msra.mxu0 %v3271_v51  ;;  %2218 = vmatpush1.bf16.msra.mxu1 %v3274_v52  ;;  %v3355_v51 = vld [vmem:[#allocation7 + $0x560] ss:$16 sps:$4 sm:$0xff]   ;;  %v3358_v52 = vld [vmem:[#allocation7 + $0x568] ss:$16 sps:$4 sm:$0xff]  }
 0x16c   :  { %2047 = vmatprep.subr.bf16.mxu0 %v3279_v53  ;;  %2219 = vmatprep.subr.bf16.mxu1 %v3282_v54  ;;  %v3363_v53 = vld [vmem:[#allocation7 + $0x584] ss:$16 sps:$4 sm:$0xff]   ;;  %v3366_v54 = vld [vmem:[#allocation7 + $0x58c] ss:$16 sps:$4 sm:$0xff]  }
 0x16f   :  { %2048 = vmatpush1.bf16.msra.mxu0 %v3277_v55  ;;  %2220 = vmatpush1.bf16.msra.mxu1 %v3280_v56  ;;  %v3361_v55 = vld [vmem:[#allocation7 + $0x580] ss:$16 sps:$4 sm:$0xff]   ;;  %v3364_v56 = vld [vmem:[#allocation7 + $0x588] ss:$16 sps:$4 sm:$0xff]  }
 0x170   :  { %2049 = vmatprep.subr.bf16.mxu0 %v3285_v57  ;;  %2221 = vmatprep.subr.bf16.mxu1 %v3288_v58  ;;  %v3369_v57 = vld [vmem:[#allocation7 + $0x5a4] ss:$16 sps:$4 sm:$0xff]   ;;  %v3372_v58 = vld [vmem:[#allocation7 + $0x5ac] ss:$16 sps:$4 sm:$0xff]  }
 0x173   :  { %2050 = vmatpush1.bf16.msra.mxu0 %v3283_v59  ;;  %2222 = vmatpush1.bf16.msra.mxu1 %v3286_v60  ;;  %v3367_v59 = vld [vmem:[#allocation7 + $0x5a0] ss:$16 sps:$4 sm:$0xff]   ;;  %v3370_v60 = vld [vmem:[#allocation7 + $0x5a8] ss:$16 sps:$4 sm:$0xff]  }
 0x174   :  { %2062 = vmatprep.subr.bf16.mxu0 %v3291_v61  ;;  %2234 = vmatprep.subr.bf16.mxu1 %v3294_v62  ;;  %v3375_v61 = vld [vmem:[#allocation7 + $0x5c4] ss:$16 sps:$4 sm:$0xff]   ;;  %v3378_v62 = vld [vmem:[#allocation7 + $0x5cc] ss:$16 sps:$4 sm:$0xff]  }
 0x176   :  { %2052 = vmatmul.mubr.bf16.vlgmr.msra.gmra.mrb[8].mxu0 %v3757_v20  ;;  %2224 = vmatmul.mubr.bf16.vlgmr.msra.gmra.mrb[8].mxu1 %v3757_v20  ;;  %v3312_v20 = vld [vmem:[#allocation7 + $0x46c] ss:$16 sps:$4 sm:$0xff]  }
 0x177   :  { %2063 = vmatpush1.bf16.msra.mxu0 %v3289_v63  ;;  %2235 = vmatpush1.bf16.msra.mxu1 %v3292_v0  ;;  %v3373_v63 = vld [vmem:[#allocation7 + $0x5c0] ss:$16 sps:$4 sm:$0xff]   ;;  %v3376_v0 = vld [vmem:[#allocation7 + $0x5c8] ss:$16 sps:$4 sm:$0xff]  }
 0x178   :  { %2064 = vmatprep.subr.bf16.mxu0 %v3297_v1  ;;  %2236 = vmatprep.subr.bf16.mxu1 %v3300_v2  ;;  %v3381_v1 = vld [vmem:[#allocation7 + $0x5e4] ss:$16 sps:$4 sm:$0xff]   ;;  %v3384_v2 = vld [vmem:[#allocation7 + $0x5ec] ss:$16 sps:$4 sm:$0xff]  }
 0x179   :  { %2094 = vmatprep.mubr.bf16.mxu0 %v3761_v46  ;;  %2266 = vmatprep.mubr.bf16.mxu1 %v3761_v46  ;;  %v3316_v46 = vld [vmem:[#allocation7 + $0x488] ss:$16 sps:$4 sm:$0xff]  }
 0x17b   :  { %2065 = vmatpush1.bf16.msra.mxu0 %v3295_v3  ;;  %2237 = vmatpush1.bf16.msra.mxu1 %v3298_v4  ;;  %v3379_v3 = vld [vmem:[#allocation7 + $0x5e0] ss:$16 sps:$4 sm:$0xff]   ;;  %v3382_v4 = vld [vmem:[#allocation7 + $0x5e8] ss:$16 sps:$4 sm:$0xff]  }
 0x17c   :  { %2066 = vmatprep.subr.bf16.mxu0 %v3303_v5  ;;  %2238 = vmatprep.subr.bf16.mxu1 %v3306_v6  ;;  %v3387_v5 = vld [vmem:[#allocation7 + $0x604] ss:$16 sps:$4 sm:$0xff]   ;;  %v3390_v6 = vld [vmem:[#allocation7 + $0x60c] ss:$16 sps:$4 sm:$0xff]  }
 0x17f   :  { %2067 = vmatpush1.bf16.msra.mxu0 %v3301_v7  ;;  %2239 = vmatpush1.bf16.msra.mxu1 %v3304_v8  ;;  %v3385_v7 = vld [vmem:[#allocation7 + $0x600] ss:$16 sps:$4 sm:$0xff]   ;;  %v3388_v8 = vld [vmem:[#allocation7 + $0x608] ss:$16 sps:$4 sm:$0xff]  }
 0x180   :  { %2068 = vmatprep.subr.bf16.mxu0 %v3309_v9  ;;  %2240 = vmatprep.subr.bf16.mxu1 %v3312_v20  ;;  %v3393_v9 = vld [vmem:[#allocation7 + $0x624] ss:$16 sps:$4 sm:$0xff]   ;;  %v3396_v20 = vld [vmem:[#allocation7 + $0x62c] ss:$16 sps:$4 sm:$0xff]  }
 0x183   :  { %2069 = vmatpush1.bf16.msra.mxu0 %v3307_v10  ;;  %2241 = vmatpush1.bf16.msra.mxu1 %v3310_v11  ;;  %v3391_v10 = vld [vmem:[#allocation7 + $0x620] ss:$16 sps:$4 sm:$0xff]   ;;  %v3394_v11 = vld [vmem:[#allocation7 + $0x628] ss:$16 sps:$4 sm:$0xff]  }
 0x184   :  { %2070 = vmatprep.subr.bf16.mxu0 %v3315_v12  ;;  %2242 = vmatprep.subr.bf16.mxu1 %v3318_v13  ;;  %v3399_v12 = vld [vmem:[#allocation7 + $0x644] ss:$16 sps:$4 sm:$0xff]   ;;  %v3402_v13 = vld [vmem:[#allocation7 + $0x64c] ss:$16 sps:$4 sm:$0xff]  }
 0x187   :  { %2071 = vmatpush1.bf16.msra.mxu0 %v3313_v14  ;;  %2243 = vmatpush1.bf16.msra.mxu1 %v3316_v46  ;;  %v3397_v14 = vld [vmem:[#allocation7 + $0x640] ss:$16 sps:$4 sm:$0xff]   ;;  %v3400_v46 = vld [vmem:[#allocation7 + $0x648] ss:$16 sps:$4 sm:$0xff]  }
 0x188   :  { %2072 = vmatprep.subr.bf16.mxu0 %v3321_v15  ;;  %2244 = vmatprep.subr.bf16.mxu1 %v3324_v16  ;;  %v3405_v15 = vld [vmem:[#allocation7 + $0x664] ss:$16 sps:$4 sm:$0xff]   ;;  %v3403_v16 = vld [vmem:[#allocation7 + $0x660] ss:$16 sps:$4 sm:$0xff]  }
 0x18b   :  { %2073 = vmatpush1.bf16.msra.mxu0 %v3319_v41  ;;  %2245 = vmatpush1.bf16.msra.mxu1 %v3322_v17  ;;  %v3406_v41 = vld [vmem:[#allocation7 + $0x668] ss:$16 sps:$4 sm:$0xff]   ;;  %v3411_v17 = vld [vmem:[#allocation7 + $0x684] ss:$16 sps:$4 sm:$0xff]  }
 0x18c   :  { %2074 = vmatprep.subr.bf16.mxu0 %v3327_v19  ;;  %2246 = vmatprep.subr.bf16.mxu1 %v3330_v21  ;;  %v3414_v19 = vld [vmem:[#allocation7 + $0x68c] ss:$16 sps:$4 sm:$0xff]   ;;  %v3409_v21 = vld [vmem:[#allocation7 + $0x680] ss:$16 sps:$4 sm:$0xff]  }
 0x18f   :  { %2075 = vmatpush1.bf16.msra.mxu0 %v3325_v23  ;;  %2247 = vmatpush1.bf16.msra.mxu1 %v3328_v24  ;;  %v3417_v23 = vld [vmem:[#allocation7 + $0x6a4] ss:$16 sps:$4 sm:$0xff]   ;;  %v3420_v24 = vld [vmem:[#allocation7 + $0x6ac] ss:$16 sps:$4 sm:$0xff]  }
 0x190   :  { %2076 = vmatprep.subr.bf16.mxu0 %v3333_v25  ;;  %2248 = vmatprep.subr.bf16.mxu1 %v3336_v26  ;;  %v3415_v25 = vld [vmem:[#allocation7 + $0x6a0] ss:$16 sps:$4 sm:$0xff]   ;;  %v3418_v26 = vld [vmem:[#allocation7 + $0x6a8] ss:$16 sps:$4 sm:$0xff]  }
 0x193   :  { %2077 = vmatpush1.bf16.msra.mxu0 %v3331_v27  ;;  %2249 = vmatpush1.bf16.msra.mxu1 %v3334_v28  ;;  %v3423_v27 = vld [vmem:[#allocation7 + $0x6c4] ss:$16 sps:$4 sm:$0xff]   ;;  %v3426_v28 = vld [vmem:[#allocation7 + $0x6cc] ss:$16 sps:$4 sm:$0xff]  }
 0x194   :  { %2078 = vmatprep.subr.bf16.mxu0 %v3339_v29  ;;  %2250 = vmatprep.subr.bf16.mxu1 %v3342_v30  ;;  %v3421_v29 = vld [vmem:[#allocation7 + $0x6c0] ss:$16 sps:$4 sm:$0xff]   ;;  %v3424_v30 = vld [vmem:[#allocation7 + $0x6c8] ss:$16 sps:$4 sm:$0xff]  }
 0x197   :  { %2079 = vmatpush1.bf16.msra.mxu0 %v3337_v31  ;;  %2251 = vmatpush1.bf16.msra.mxu1 %v3340_v32  ;;  %v3429_v31 = vld [vmem:[#allocation7 + $0x6e4] ss:$16 sps:$4 sm:$0xff]   ;;  %v3432_v32 = vld [vmem:[#allocation7 + $0x6ec] ss:$16 sps:$4 sm:$0xff]  }
 0x198   :  { %2080 = vmatprep.subr.bf16.mxu0 %v3345_v33  ;;  %2252 = vmatprep.subr.bf16.mxu1 %v3348_v34  ;;  %v3427_v33 = vld [vmem:[#allocation7 + $0x6e0] ss:$16 sps:$4 sm:$0xff]   ;;  %v3430_v34 = vld [vmem:[#allocation7 + $0x6e8] ss:$16 sps:$4 sm:$0xff]  }
 0x19b   :  { %2081 = vmatpush1.bf16.msra.mxu0 %v3343_v35  ;;  %2253 = vmatpush1.bf16.msra.mxu1 %v3346_v36  ;;  %v3435_v35 = vld [vmem:[#allocation7 + $0x704] ss:$16 sps:$4 sm:$0xff]   ;;  %v3438_v36 = vld [vmem:[#allocation7 + $0x70c] ss:$16 sps:$4 sm:$0xff]  }
 0x19c   :  { %2082 = vmatprep.subr.bf16.mxu0 %v3351_v38  ;;  %2254 = vmatprep.subr.bf16.mxu1 %v3354_v45  ;;  %v3433_v38 = vld [vmem:[#allocation7 + $0x700] ss:$16 sps:$4 sm:$0xff]   ;;  %v3436_v45 = vld [vmem:[#allocation7 + $0x708] ss:$16 sps:$4 sm:$0xff]  }
 0x19f   :  { %2083 = vmatpush1.bf16.msra.mxu0 %v3349_v47  ;;  %2255 = vmatpush1.bf16.msra.mxu1 %v3352_v48  ;;  %v3441_v47 = vld [vmem:[#allocation7 + $0x724] ss:$16 sps:$4 sm:$0xff]   ;;  %v3444_v48 = vld [vmem:[#allocation7 + $0x72c] ss:$16 sps:$4 sm:$0xff]  }
 0x1a0   :  { %2084 = vmatprep.subr.bf16.mxu0 %v3357_v49  ;;  %2256 = vmatprep.subr.bf16.mxu1 %v3360_v50  ;;  %v3439_v49 = vld [vmem:[#allocation7 + $0x720] ss:$16 sps:$4 sm:$0xff]   ;;  %v3442_v50 = vld [vmem:[#allocation7 + $0x728] ss:$16 sps:$4 sm:$0xff]  }
 0x1a3   :  { %2085 = vmatpush1.bf16.msra.mxu0 %v3355_v51  ;;  %2257 = vmatpush1.bf16.msra.mxu1 %v3358_v52  ;;  %v3447_v51 = vld [vmem:[#allocation7 + $0x744] ss:$16 sps:$4 sm:$0xff]   ;;  %v3450_v52 = vld [vmem:[#allocation7 + $0x74c] ss:$16 sps:$4 sm:$0xff]  }
 0x1a4   :  { %2086 = vmatprep.subr.bf16.mxu0 %v3363_v53  ;;  %2258 = vmatprep.subr.bf16.mxu1 %v3366_v54  ;;  %v3445_v53 = vld [vmem:[#allocation7 + $0x740] ss:$16 sps:$4 sm:$0xff]   ;;  %v3448_v54 = vld [vmem:[#allocation7 + $0x748] ss:$16 sps:$4 sm:$0xff]  }
 0x1a7   :  { %2087 = vmatpush1.bf16.msra.mxu0 %v3361_v55  ;;  %2259 = vmatpush1.bf16.msra.mxu1 %v3364_v56  ;;  %v3453_v55 = vld [vmem:[#allocation7 + $0x764] ss:$16 sps:$4 sm:$0xff]   ;;  %v3456_v56 = vld [vmem:[#allocation7 + $0x76c] ss:$16 sps:$4 sm:$0xff]  }
 0x1a8   :  { %2088 = vmatprep.subr.bf16.mxu0 %v3369_v57  ;;  %2260 = vmatprep.subr.bf16.mxu1 %v3372_v58  ;;  %v3451_v57 = vld [vmem:[#allocation7 + $0x760] ss:$16 sps:$4 sm:$0xff]   ;;  %v3454_v58 = vld [vmem:[#allocation7 + $0x768] ss:$16 sps:$4 sm:$0xff]  }
 0x1ab   :  { %2089 = vmatpush1.bf16.msra.mxu0 %v3367_v59  ;;  %2261 = vmatpush1.bf16.msra.mxu1 %v3370_v60  ;;  %v3459_v59 = vld [vmem:[#allocation7 + $0x784] ss:$16 sps:$4 sm:$0xff]   ;;  %v3462_v60 = vld [vmem:[#allocation7 + $0x78c] ss:$16 sps:$4 sm:$0xff]  }
 0x1ac   :  { %2090 = vmatprep.subr.bf16.mxu0 %v3375_v61  ;;  %2262 = vmatprep.subr.bf16.mxu1 %v3378_v62  ;;  %v3457_v61 = vld [vmem:[#allocation7 + $0x780] ss:$16 sps:$4 sm:$0xff]   ;;  %v3460_v62 = vld [vmem:[#allocation7 + $0x788] ss:$16 sps:$4 sm:$0xff]  }
 0x1af   :  { %2091 = vmatpush1.bf16.msra.mxu0 %v3373_v63  ;;  %2263 = vmatpush1.bf16.msra.mxu1 %v3376_v0  ;;  %v3465_v63 = vld [vmem:[#allocation7 + $0x7a4] ss:$16 sps:$4 sm:$0xff]   ;;  %v3468_v0 = vld [vmem:[#allocation7 + $0x7ac] ss:$16 sps:$4 sm:$0xff]  }
 0x1b0   :  { %2092 = vmatprep.subr.bf16.mxu0 %v3381_v1  ;;  %2264 = vmatprep.subr.bf16.mxu1 %v3384_v2  ;;  %v3463_v1 = vld [vmem:[#allocation7 + $0x7a0] ss:$16 sps:$4 sm:$0xff]   ;;  %v3466_v2 = vld [vmem:[#allocation7 + $0x7a8] ss:$16 sps:$4 sm:$0xff]  }
 0x1b3   :  { %2093 = vmatpush1.bf16.msra.mxu0 %v3379_v3  ;;  %2265 = vmatpush1.bf16.msra.mxu1 %v3382_v4  ;;  %v3471_v3 = vld [vmem:[#allocation7 + $0x7c4] ss:$16 sps:$4 sm:$0xff]   ;;  %v3474_v4 = vld [vmem:[#allocation7 + $0x7cc] ss:$16 sps:$4 sm:$0xff]  }
 0x1b4   :  { %2105 = vmatprep.subr.bf16.mxu0 %v3387_v5  ;;  %2277 = vmatprep.subr.bf16.mxu1 %v3390_v6  ;;  %v3469_v5 = vld [vmem:[#allocation7 + $0x7c0] ss:$16 sps:$4 sm:$0xff]   ;;  %v3472_v6 = vld [vmem:[#allocation7 + $0x7c8] ss:$16 sps:$4 sm:$0xff]  }
 0x1b6   :  { %2095 = vmatmul.mubr.bf16.vlgmr.msra.gmra.mrb[8].mxu0 %v3759_v37  ;;  %2267 = vmatmul.mubr.bf16.vlgmr.msra.gmra.mrb[8].mxu1 %v3759_v37  ;;  %v3408_v37 = vld [vmem:[#allocation7 + $0x66c] ss:$16 sps:$4 sm:$0xff]  }
 0x1b7   :  { %2106 = vmatpush1.bf16.msra.mxu0 %v3385_v7  ;;  %2278 = vmatpush1.bf16.msra.mxu1 %v3388_v8  ;;  %v3477_v7 = vld [vmem:[#allocation7 + $0x7e4] ss:$16 sps:$4 sm:$0xff]   ;;  %v3480_v8 = vld [vmem:[#allocation7 + $0x7ec] ss:$16 sps:$4 sm:$0xff]  }
 0x1b8   :  { %2107 = vmatprep.subr.bf16.mxu0 %v3393_v9  ;;  %2279 = vmatprep.subr.bf16.mxu1 %v3396_v20  ;;  %v3475_v9 = vld [vmem:[#allocation7 + $0x7e0] ss:$16 sps:$4 sm:$0xff]   ;;  %v3478_v20 = vld [vmem:[#allocation7 + $0x7e8] ss:$16 sps:$4 sm:$0xff]  }
 0x1b9   :  { %2137 = vmatprep.mubr.bf16.mxu0 %v3769_v22  ;;  %2309 = vmatprep.mubr.bf16.mxu1 %v3769_v22  ;;  %v3412_v22 = vld [vmem:[#allocation7 + $0x688] ss:$16 sps:$4 sm:$0xff]  }
 0x1bb   :  { %2108 = vmatpush1.bf16.msra.mxu0 %v3391_v10  ;;  %2280 = vmatpush1.bf16.msra.mxu1 %v3394_v11  ;;  %v3481_v10 = vld [vmem:[#allocation8 + $0x40] sm:$0xff]  }
 0x1bc   :  { %2109 = vmatprep.subr.bf16.mxu0 %v3399_v12  ;;  %2281 = vmatprep.subr.bf16.mxu1 %v3402_v13  ;;  %v3482_v11 = vld [vmem:[#allocation8 + $0xc0] sm:$0xff]  }
 0x1bd   :  { %v3483_v12 = vld [vmem:[#allocation8] sm:$0xff]  }
 0x1be   :  { %v3484_v13 = vld [vmem:[#allocation8 + $0x80] sm:$0xff]  }
 0x1bf   :  { %2110 = vmatpush1.bf16.msra.mxu0 %v3397_v14  ;;  %2282 = vmatpush1.bf16.msra.mxu1 %v3400_v46  ;;  %v3485_v14 = vld [vmem:[#allocation8 + $0x48] sm:$0xff]  }
 0x1c0   :  { %2111 = vmatprep.subr.bf16.mxu0 %v3405_v15  ;;  %2283 = vmatprep.subr.bf16.mxu1 %v3408_v37  ;;  %v3486_v46 = vld [vmem:[#allocation8 + $0xc8] sm:$0xff]  }
 0x1c1   :  { %v3487_v15 = vld [vmem:[#allocation8 + $0x8] sm:$0xff]  }
 0x1c2   :  { %v3488_v37 = vld [vmem:[#allocation8 + $0x88] sm:$0xff]  }
 0x1c3   :  { %2112 = vmatpush1.bf16.msra.mxu0 %v3403_v16  ;;  %2284 = vmatpush1.bf16.msra.mxu1 %v3406_v41  ;;  %v3489_v16 = vld [vmem:[#allocation8 + $0x50] sm:$0xff]  }
 0x1c4   :  { %2113 = vmatprep.subr.bf16.mxu0 %v3411_v17  ;;  %2285 = vmatprep.subr.bf16.mxu1 %v3414_v19  ;;  %v3490_v41 = vld [vmem:[#allocation8 + $0xd0] sm:$0xff]  }
 0x1c5   :  { %v3491_v17 = vld [vmem:[#allocation8 + $0x10] sm:$0xff]  }
 0x1c6   :  { %v3492_v19 = vld [vmem:[#allocation8 + $0x90] sm:$0xff]  }
 0x1c7   :  { %2114 = vmatpush1.bf16.msra.mxu0 %v3409_v21  ;;  %2286 = vmatpush1.bf16.msra.mxu1 %v3412_v22  ;;  %v3493_v21 = vld [vmem:[#allocation8 + $0x58] sm:$0xff]  }
 0x1c8   :  { %2115 = vmatprep.subr.bf16.mxu0 %v3417_v23  ;;  %2287 = vmatprep.subr.bf16.mxu1 %v3420_v24  ;;  %v3494_v22 = vld [vmem:[#allocation8 + $0xd8] sm:$0xff]   ;;  %v3497_v24 = vld [vmem:[#allocation8 + $0x60] sm:$0xff]  }
 0x1c9   :  { %v3495_v23 = vld [vmem:[#allocation8 + $0x18] sm:$0xff]  }
 0x1cb   :  { %2116 = vmatpush1.bf16.msra.mxu0 %v3415_v25  ;;  %2288 = vmatpush1.bf16.msra.mxu1 %v3418_v26  ;;  %v3498_v25 = vld [vmem:[#allocation8 + $0xe0] sm:$0xff]  }
 0x1cc   :  { %2117 = vmatprep.subr.bf16.mxu0 %v3423_v27  ;;  %2289 = vmatprep.subr.bf16.mxu1 %v3426_v28  ;;  %v3499_v26 = vld [vmem:[#allocation8 + $0x20] sm:$0xff]   ;;  %v3501_v28 = vld [vmem:[#allocation8 + $0x68] sm:$0xff]  }
 0x1cd   :  { %v3500_v27 = vld [vmem:[#allocation8 + $0xa0] sm:$0xff]  }
 0x1cf   :  { %2118 = vmatpush1.bf16.msra.mxu0 %v3421_v29  ;;  %2290 = vmatpush1.bf16.msra.mxu1 %v3424_v30  ;;  %v3502_v29 = vld [vmem:[#allocation8 + $0xe8] sm:$0xff]  }
 0x1d0   :  { %2119 = vmatprep.subr.bf16.mxu0 %v3429_v31  ;;  %2291 = vmatprep.subr.bf16.mxu1 %v3432_v32  ;;  %v3503_v30 = vld [vmem:[#allocation8 + $0x28] sm:$0xff]   ;;  %v3505_v32 = vld [vmem:[#allocation8 + $0x70] sm:$0xff]  }
 0x1d1   :  { %v3504_v31 = vld [vmem:[#allocation8 + $0xa8] sm:$0xff]  }
 0x1d3   :  { %2120 = vmatpush1.bf16.msra.mxu0 %v3427_v33  ;;  %2292 = vmatpush1.bf16.msra.mxu1 %v3430_v34  ;;  %v3506_v33 = vld [vmem:[#allocation8 + $0xf0] sm:$0xff]  }
 0x1d4   :  { %2121 = vmatprep.subr.bf16.mxu0 %v3435_v35  ;;  %2293 = vmatprep.subr.bf16.mxu1 %v3438_v36  ;;  %v3507_v34 = vld [vmem:[#allocation8 + $0x30] sm:$0xff]   ;;  %v3509_v36 = vld [vmem:[#allocation8 + $0x78] sm:$0xff]  }
 0x1d5   :  { %v3508_v35 = vld [vmem:[#allocation8 + $0xb0] sm:$0xff]  }
 0x1d7   :  { %2122 = vmatpush1.bf16.msra.mxu0 %v3433_v38  ;;  %2294 = vmatpush1.bf16.msra.mxu1 %v3436_v45  ;;  %v3510_v38 = vld [vmem:[#allocation8 + $0xf8] sm:$0xff]  }
 0x1d8   :  { %2123 = vmatprep.subr.bf16.mxu0 %v3441_v47  ;;  %2295 = vmatprep.subr.bf16.mxu1 %v3444_v48  ;;  %v3511_v45 = vld [vmem:[#allocation8 + $0x38] sm:$0xff]  }
 0x1d9   :  { %v3512_v47 = vld [vmem:[#allocation8 + $0xb8] sm:$0xff]  }
 0x1da   :  { %v674_v48 = vld [vmem:[%s3814_s4 + $0x8] sm:$0xf] }
 0x1db   :  { %2124 = vmatpush1.bf16.msra.mxu0 %v3439_v49  ;;  %2296 = vmatpush1.bf16.msra.mxu1 %v3442_v50  ;;  %v679_v49 = vrot.slane %v674_v48, %v100_v40  ;;  %v687_v50 = vrot.slane %v674_v48, %v108_v43 }
 0x1dc   :  { %2125 = vmatprep.subr.bf16.mxu0 %v3447_v51  ;;  %2297 = vmatprep.subr.bf16.mxu1 %v3450_v52  ;;  %v683_v51 = vrot.slane %v674_v48, %v104_v42  ;;  %v691_v52 = vrot.slane %v674_v48, %v112_v44 }
 0x1df   :  { %2126 = vmatpush1.bf16.msra.mxu0 %v3445_v53  ;;  %2298 = vmatpush1.bf16.msra.mxu1 %v3448_v54 }
 0x1e0   :  { %2127 = vmatprep.subr.bf16.mxu0 %v3453_v55  ;;  %2299 = vmatprep.subr.bf16.mxu1 %v3456_v56 }
 0x1e3   :  { %2128 = vmatpush1.bf16.msra.mxu0 %v3451_v57  ;;  %2300 = vmatpush1.bf16.msra.mxu1 %v3454_v58 }
 0x1e4   :  { %2129 = vmatprep.subr.bf16.mxu0 %v3459_v59  ;;  %2301 = vmatprep.subr.bf16.mxu1 %v3462_v60 }
 0x1e7   :  { %2130 = vmatpush1.bf16.msra.mxu0 %v3457_v61  ;;  %2302 = vmatpush1.bf16.msra.mxu1 %v3460_v62 }
 0x1e8   :  { %2131 = vmatprep.subr.bf16.mxu0 %v3465_v63  ;;  %2303 = vmatprep.subr.bf16.mxu1 %v3468_v0 }
 0x1eb   :  { %2132 = vmatpush1.bf16.msra.mxu0 %v3463_v1  ;;  %2304 = vmatpush1.bf16.msra.mxu1 %v3466_v2 }
 0x1ec   :  { %2133 = vmatprep.subr.bf16.mxu0 %v3471_v3  ;;  %2305 = vmatprep.subr.bf16.mxu1 %v3474_v4 }
 0x1ef   :  { %2134 = vmatpush1.bf16.msra.mxu0 %v3469_v5  ;;  %2306 = vmatpush1.bf16.msra.mxu1 %v3472_v6 }
 0x1f0   :  { %2135 = vmatprep.subr.bf16.mxu0 %v3477_v7  ;;  %2307 = vmatprep.subr.bf16.mxu1 %v3480_v8 }
 0x1f3   :  { %2136 = vmatpush1.bf16.msra.mxu0 %v3475_v9  ;;  %2308 = vmatpush1.bf16.msra.mxu1 %v3478_v20 }
 0x1f4   :  { %3007 = vmatprep.subr.bf16.mxu0 %v3481_v10  ;;  %3029 = vmatprep.subr.bf16.mxu1 %v3482_v11 }
 0x1f6   :  { %2138 = vmatmul.mubr.bf16.vlgmr.msra.gmra.mrb[8].mxu0 %v3767_v18  ;;  %2310 = vmatmul.mubr.bf16.vlgmr.msra.gmra.mrb[8].mxu1 %v3767_v18  ;;  %v3496_v18 = vld [vmem:[#allocation8 + $0x98] sm:$0xff]  }
 0x1f7   :  { %3008 = vmatpush3.bf16.msra.mxu0 %v3483_v12  ;;  %3030 = vmatpush3.bf16.msra.mxu1 %v3484_v13  ;;  %v2974_v13 = vld [vmem:[%s3814_s4 + $0xc] ss:$0 sm:$0xff]  ;;  %s3601_s4 = scalar_lea.vmem %s2685_s28, 256 }
 0x1f8   :  { %3009 = vmatprep.subr.bf16.mxu0 %v3485_v14  ;;  %3031 = vmatprep.subr.bf16.mxu1 %v3486_v46  ;;  %p3602_p4 = scmp.ne.s32.totalorder %s2685_s28, %s3601_s4  ;;  %p3607_p6 = scmp.lt.s32.totalorder %s3601_s4, %s3601_s4 }
 0x1fa   :  { %p3608_p7 = por %p3607_p6, %p3606_p5 }
 0x1fb   :  { %3010 = vmatpush3.bf16.msra.mxu0 %v3487_v15  ;;  %3032 = vmatpush3.bf16.msra.mxu1 %v3488_v37 }
 0x1fc   :  { %3011 = vmatprep.subr.bf16.mxu0 %v3489_v16  ;;  %3033 = vmatprep.subr.bf16.mxu1 %v3490_v41  ;;  %p3609_p8 = pnand %p3608_p7, %p3602_p4 }
 0x1ff   :  { %3012 = vmatpush3.bf16.msra.mxu0 %v3491_v17  ;;  %3034 = vmatpush3.bf16.msra.mxu1 %v3492_v19 }
 0x200   :  { %3013 = vmatprep.subr.bf16.mxu0 %v3493_v21  ;;  %3035 = vmatprep.subr.bf16.mxu1 %v3494_v22 }
 0x203   :  { %3014 = vmatpush3.bf16.msra.mxu0 %v3495_v23  ;;  %3036 = vmatpush3.bf16.msra.mxu1 %v3496_v18 }
 0x204   :  { %3015 = vmatprep.subr.bf16.mxu0 %v3497_v24  ;;  %3037 = vmatprep.subr.bf16.mxu1 %v3498_v25 }
 0x207   :  { %3016 = vmatpush3.bf16.msra.mxu0 %v3499_v26  ;;  %3038 = vmatpush3.bf16.msra.mxu1 %v3500_v27 }
 0x208   :  { %3017 = vmatprep.subr.bf16.mxu0 %v3501_v28  ;;  %3039 = vmatprep.subr.bf16.mxu1 %v3502_v29 }
 0x20b   :  { %3018 = vmatpush3.bf16.msra.mxu0 %v3503_v30  ;;  %3040 = vmatpush3.bf16.msra.mxu1 %v3504_v31 }
 0x20c   :  { %3019 = vmatprep.subr.bf16.mxu0 %v3505_v32  ;;  %3041 = vmatprep.subr.bf16.mxu1 %v3506_v33 }
 0x20f   :  { %3020 = vmatpush3.bf16.msra.mxu0 %v3507_v34  ;;  %3042 = vmatpush3.bf16.msra.mxu1 %v3508_v35 }
 0x210   :  { %3021 = vmatprep.subr.bf16.mxu0 %v3509_v36  ;;  %3043 = vmatprep.subr.bf16.mxu1 %v3510_v38 }
 0x213   :  { %3022 = vmatpush3.bf16.msra.mxu0 %v3511_v45  ;;  %3044 = vmatpush3.bf16.msra.mxu1 %v3512_v47 }
 0x2c9   :  { %v2139_v53 = vpop.f32.mrb[8].mxu0  ;;  %v2311_v54 = vpop.f32.mrb[8].mxu1 }
 0x2ca   :  { %v3051_v55 = vadd.f32 %v2139_v53, %v679_v49  ;;  %v3055_v56 = vadd.f32 %v2311_v54, %v687_v50  ;;  %v2141_v57 = vpop.f32.mrb[9].mxu0  ;;  %v2313_v58 = vpop.f32.mrb[9].mxu1 }
 0x2cb   :  { %v3052_v59 = vadd.f32 %v2141_v57, %v683_v51  ;;  %v3056_v60 = vadd.f32 %v2313_v58, %v691_v52  ;;  %v2143_v61 = vpop.f32.mrb[10].mxu0  ;;  %v2315_v62 = vpop.f32.mrb[10].mxu1 }
 0x2cc   :  { %v3053_v40 = vadd.f32 %v2143_v61, %v679_v49  ;;  %v3057_v63 = vadd.f32 %v2315_v62, %v687_v50  ;;  %v2145_v0 = vpop.f32.mrb[11].mxu0  ;;  %v2317_v43 = vpop.f32.mrb[11].mxu1  ;;  %v2320_v42 = vmax.f32 %v3051_v55, 0.0  ;;  %v2322_v3 = vmax.f32 %v3055_v56, 0.0 }
 0x2cd   :  { %v3054_v1 = vadd.f32 %v2145_v0, %v683_v51  ;;  %v3058_v2 = vadd.f32 %v2317_v43, %v691_v52  ;;  %v2321_v4 = vmax.f32 %v3052_v59, 0.0  ;;  %v2323_v5 = vmax.f32 %v3056_v60, 0.0 }
 0x2ce   :  { %v2324_v39 = vmax.f32 %v3053_v40, 0.0  ;;  %v2326_v44 = vmax.f32 %v3057_v63, 0.0 }
 0x2cf   :  { %v2325_v6 = vmax.f32 %v3054_v1, 0.0  ;;  %v2327_v7 = vmax.f32 %v3058_v2, 0.0 }
 0x2d0   :  { %v2328_v8 = vpack.c.bf16 %v2324_v39, %v2320_v42  ;;  %v2330_v9 = vpack.c.bf16 %v2326_v44, %v2322_v3 }
 0x2d1   :  { %v2329_v20 = vpack.c.bf16 %v2325_v6, %v2321_v4  ;;  %v2331_v10 = vpack.c.bf16 %v2327_v7, %v2323_v5 }
 0x2d3   :  { %2627 = vmatprep.mubr.bf16.mxu0 %v2329_v20  ;;  %2668 = vmatprep.mubr.bf16.mxu1 %v2331_v10 }
 0x2d4   :  { %2628 = vmatmul.mubr.bf16.vlgmr.msra.gmra.mrb[12].mxu0 %v2328_v8  ;;  %2669 = vmatmul.mubr.bf16.vlgmr.msra.gmra.mrb[12].mxu1 %v2330_v9 }
 0x3a7   :  { %v3023_v11 = vpop.f32.mrb[12].mxu0  ;;  %v3045_v12 = vpop.f32.mrb[12].mxu1 }
 0x3a8   :  { %v3024_v14 = vpop.f32.mrb[13].mxu0  ;;  %v3046_v46 = vpop.f32.mrb[13].mxu1 }
 0x3a9   :  { %v3025_v15 = vadd.f32 %v3024_v14, %v3023_v11  ;;  %v3047_v37 = vadd.f32 %v3046_v46, %v3045_v12  ;;  %v3026_v16 = vpop.f32.mrb[14].mxu0  ;;  %v3048_v41 = vpop.f32.mrb[14].mxu1 }
 0x3aa   :  { %v3027_v17 = vpop.f32.mrb[15].mxu0  ;;  %v3049_v19 = vpop.f32.mrb[15].mxu1 }
 0x3ab   :  { %v2630_v21 = vadd.f32 %v3025_v15, %v2974_v13  ;;  %v3028_v22 = vadd.f32 %v3027_v17, %v3026_v16  ;;  %v3050_v23 = vadd.f32 %v3049_v19, %v3048_v41 }
 0x3ad   :  { %v2671_v18 = vadd.f32 %v3047_v37, %v2630_v21  ;;  %v2633_v24 = vadd.f32 %v3028_v22, %v2974_v13 }
 0x3af   :  { %2677 = vst [vmem:[#allocation10] sm:$0xff] %v2671_v18  ;;  %v2674_v25 = vadd.f32 %v3050_v23, %v2633_v24 }
 0x3b1   :  { %2678 = vst [vmem:[#allocation10 + $0x8] sm:$0xff] %v2674_v25 }
 0x3b2   :  { %3612 = shalt.err (!%p3609_p8)
}
 0x3b3   :  { %s3613_s30 = scalar_lea.hbm %s3815_s5, 256 }
 0x3b4   :  { %p3614_p9 = scmp.ne.s32.totalorder %s3815_s5, %s3613_s30  ;;  %p3617_p10 = scmp.lt.u32.totalorder %s3613_s30, %s3815_s5 }
 0x3b6   :  { %p3619_p11 = pnand %p3617_p10, %p3614_p9 }
 0x3b8   :  { %3622 = shalt.err (!%p3619_p11)
}
 0x3b9   :  { %2690 = dma.vmem_to_hbm [thread:$0]  %s2685_s28, 256, %s3815_s5, [#allocation4], %s3635_s1, %s3635_s1, %s3636_s17  }
 0x3ba   :  { %3629 = dma.done.wait [#allocation4], 256  }
 0x3bb   :  { %3630 = vsyncadd [#allocation4], 4294967040 }
 0x3bc   :  { %2694 = vsyncpa [#allocation3], 1 }
 0x3bd   :  { %2695 = vsyncpa [#allocation6], 1 }
 0x3be   :  { %2696 = vsyncpa [#allocation9], 1 }
 0x3bf   :  { %2697 = vsyncpa [#allocation4], 1 }

</bundles_post_ra>
